<compile_context>
chip_gen: v7x
topology: tpu7x:2x2x1
jax: 0.10.0
libtpu: 0.0.40
codegen_flags: <defaults>
</compile_context>

<pallas_src>
import functools

import jax
import jax.numpy as jnp
from jax import lax
from jax.experimental import pallas as pl
from jax.experimental.pallas import tpu as pltpu

BN_EPS = 1e-5
_LANE = 128


# ----------------------------------------------------------------------------
# Pallas kernel: fused MultiAttentionBlock hot path over one spatial tile.
# ----------------------------------------------------------------------------
def _mab_kernel(x_ref, pg_ref, w_ref, b_ref, out_ref, att_ref, *, chunk):
    f32 = jnp.float32
    c = x_ref.shape[0]
    ci2 = pg_ref.shape[0]           # 2 * inter_channels (both gates stacked)
    tile = x_ref.shape[-1]
    dot_dt = x_ref.dtype            # bf16 in production -> native bf16 MXU passes

    # Unpack the packed weights once per grid step (tiny; hoisted out of the loop).
    wb = w_ref[...]                                   # (ci2 + 2 + c, ncols) f32
    wt = wb[0:ci2, 0:c].astype(dot_dt)                # theta, both gates stacked
    wp = wb[ci2:ci2 + 2, 0:ci2].astype(dot_dt)        # psi, block-diagonal
    m = wb[ci2 + 2:, 0:2 * c].astype(dot_dt)          # [combine.BN.W.BN g1 | g2]
    b = b_ref[...]                                    # (2 + c, 1) f32
    bp = b[0:2, :]
    b_out = b[2:, :]

    def body(j, carry):
        off = pl.multiple_of(j * chunk, chunk)
        x = x_ref[:, pl.ds(off, chunk)]                    # (c, chunk)   io dtype
        pg = pg_ref[:, pl.ds(off, chunk)].astype(f32)      # (ci2, chunk) f32

        # theta(x) for both gates in one MXU pass; f = relu(theta_x + phi_g_up)
        th = jnp.dot(wt, x, preferred_element_type=f32)    # (ci2, chunk)
        f = jnp.maximum(th + pg, 0.0)

        # att = sigmoid(psi(f)) for both gates at once -> lane-dense (2, chunk)
        att = jax.nn.sigmoid(
            jnp.dot(wp, f.astype(dot_dt), preferred_element_type=f32) + bp)

        # Gated inputs for both gates; single fused tail matmul (c, 2c)x(2c, chunk).
        xf = x.astype(f32)
        y = jnp.concatenate([att[0:1, :] * xf, att[1:2, :] * xf], axis=0)
        out = jnp.dot(m, y.astype(dot_dt), preferred_element_type=f32) + b_out

        out_ref[:, pl.ds(off, chunk)] = jnp.maximum(out, 0.0).astype(out_ref.dtype)
        att_ref[:, pl.ds(off, chunk)] = att.astype(att_ref.dtype)
        return carry

    # Bounded vreg live ranges: iterate 512-lane sub-chunks, fully unrolled.
    lax.fori_loop(0, tile // chunk, body, 0, unroll=True)


# ----------------------------------------------------------------------------
# Glue: trilinear upsample (PyTorch align_corners=False semantics, separable)
# ----------------------------------------------------------------------------
def _interp_matrix(in_size, out_size):
    i = jnp.arange(out_size, dtype=jnp.float32)
    src = (i + 0.5) * (in_size / out_size) - 0.5
    src = jnp.clip(src, 0.0, float(in_size - 1))
    i0 = jnp.floor(src).astype(jnp.int32)
    i1 = jnp.minimum(i0 + 1, in_size - 1)
    w1 = src - i0.astype(jnp.float32)
    w0 = 1.0 - w1
    m = jnp.zeros((out_size, in_size), jnp.float32)
    m = m.at[jnp.arange(out_size), i0].add(w0)
    m = m.at[jnp.arange(out_size), i1].add(w1)
    return m  # (out, in)


def _phi_upsample_flat(g, wphi, bphi, out_thw):
    """phi conv (1x1x1, channels-first) on g + trilinear upsample, as (N, Cout, S)."""
    n = g.shape[0]
    t_out, h_out, w_out = out_thw
    pg = jnp.einsum('oc,ncthw->nothw', wphi, g) + bphi[None, :, None, None, None]
    mt = _interp_matrix(g.shape[2], t_out)
    mh = _interp_matrix(g.shape[3], h_out)
    mw = _interp_matrix(g.shape[4], w_out)
    up = jnp.einsum('nothw,Tt,Hh,Ww->noTHW', pg, mt, mh, mw)
    return up.reshape(n, -1, t_out * h_out * w_out)


# ----------------------------------------------------------------------------
# Wrapper
# ----------------------------------------------------------------------------
def _fold_bn(w, b, bn):
    """Fold eval-mode BatchNorm (running stats) into the preceding 1x1x1 conv."""
    scale = bn['gamma'] / jnp.sqrt(bn['rv'] + BN_EPS)
    shift = bn['beta'] - bn['rm'] * scale
    return w * scale[:, None], b * scale + shift


def _choose_tile(s, n, max_tile):
    """Pick the DMA tile (multiple of 128) and the in-kernel sub-chunk size."""
    s_ceil = -(-s // _LANE) * _LANE
    tile = min(max_tile, s_ceil)
    if n == 1 and s_ceil >= 2 * _LANE:
        # Keep >=2 grid units on a 'parallel' axis so v7x's second TC has work.
        tile = min(tile, max(_LANE, (s_ceil // 2) // _LANE * _LANE))
    tile = max(_LANE, (tile // _LANE) * _LANE)
    chunk = 512
    while tile % chunk:
        chunk //= 2
    return tile, chunk


def multi_attention_block(x, g, params, max_tile=4096, io_dtype=jnp.bfloat16):
    n, c, t, h, w = x.shape
    s = t * h * w
    p1, p2, pc = params['g1'], params['g2'], params['comb']
    ci = p1['wt'].shape[0]
    ci2 = 2 * ci

    # ---- fold BN (eval) and collapse the linear tail outside the kernel --------
    weff1, beff1 = _fold_bn(p1['ww'], p1['bw'], p1['bn'])
    weff2, beff2 = _fold_bn(p2['ww'], p2['bw'], p2['bn'])
    wc_eff, bc_eff = _fold_bn(pc['wc'], pc['bc'], pc['bn'])
    wc1, wc2 = wc_eff[:, :c], wc_eff[:, c:]
    m_all = jnp.concatenate([wc1 @ weff1, wc2 @ weff2], axis=1)      # (c, 2c)
    b_out = wc1 @ beff1 + wc2 @ beff2 + bc_eff

    # ---- pack ALL small weights into one f32 operand (fewer DMA streams /
    #      double-buffers); weights stay f32 (they are ~1-2 KiB of HBM traffic) ---
    wt_all = jnp.concatenate([p1['wt'], p2['wt']], axis=0)           # (ci2, c)
    ncols = max(c, ci2, 2 * c)
    nrows = ci2 + 2 + c
    w_pack = jnp.zeros((nrows, ncols), jnp.float32)
    w_pack = w_pack.at[0:ci2, 0:c].set(wt_all)
    w_pack = w_pack.at[ci2, 0:ci].set(p1['wp'][0])
    w_pack = w_pack.at[ci2 + 1, ci:ci2].set(p2['wp'][0])
    w_pack = w_pack.at[ci2 + 2:, 0:2 * c].set(m_all)
    b_pack = jnp.concatenate(
        [jnp.stack([p1['bp'], p2['bp']]), b_out]).reshape(2 + c, 1).astype(jnp.float32)

    # ---- glue: fused phi(g) for both gates + trilinear upsample -----------------
    wphi_all = jnp.concatenate([p1['wphi'], p2['wphi']], axis=0)     # (ci2, c)
    bphi_all = jnp.concatenate([p1['bphi'], p2['bphi']], axis=0)
    pg = _phi_upsample_flat(g, wphi_all, bphi_all, (t, h, w))        # (n, ci2, s)

    # ---- channels-first flattened layout: pure reshape, no HBM transpose --------
    x_flat = x.reshape(n, c, s).astype(io_dtype)     # bf16 activations at the HBM
    pg = pg.astype(io_dtype)                         # boundary halve memory traffic
    tile, chunk = _choose_tile(s, n, max_tile)
    s_pad = -(-s // tile) * tile
    if s_pad != s:
        pad = ((0, 0), (0, 0), (0, s_pad - s))
        x_flat = jnp.pad(x_flat, pad)
        pg = jnp.pad(pg, pad)

    tile_map = lambda bi, si: (bi, 0, si)
    const_map = lambda bi, si: (0, 0)   # constant index -> fetched once, no re-DMA
    grid = (n, s_pad // tile)

    # VMEM budget: ~2 buffers x (x + pg + out + att) tiles + ~2 KiB of weights.
    # Re-derived from the actual per-step footprint; capped below v7x's 64 MiB.
    per_step = (2 * c + ci2 + 2) * tile * jnp.dtype(io_dtype).itemsize
    vmem_bytes = int(min(48 * 1024 * 1024, max(16 * 1024 * 1024, 4 * per_step)))

    out_flat, att_flat = pl.pallas_call(
        functools.partial(_mab_kernel, chunk=chunk),
        grid=grid,
        in_specs=[
            pl.BlockSpec((None, c, tile), tile_map),      # x
            pl.BlockSpec((None, ci2, tile), tile_map),    # phi(g) upsampled, both gates
            pl.BlockSpec((nrows, ncols), const_map),      # packed weights (f32)
            pl.BlockSpec((2 + c, 1), const_map),          # packed biases (f32)
        ],
        out_specs=[
            pl.BlockSpec((None, c, tile), tile_map),
            pl.BlockSpec((None, 2, tile), tile_map),
        ],
        out_shape=[
            jax.ShapeDtypeStruct((n, c, s_pad), io_dtype),
            jax.ShapeDtypeStruct((n, 2, s_pad), io_dtype),
        ],
        compiler_params=pltpu.CompilerParams(
            dimension_semantics=("parallel", "parallel"),
            vmem_limit_bytes=vmem_bytes),
    )(x_flat, pg, w_pack, b_pack)

    out = out_flat[:, :, :s].reshape(n, c, t, h, w)
    att = att_flat[:, :, :s].reshape(n, 2, t, h, w)
    return out, att


# ----------------------------------------------------------------------------
# Pure-JAX reference (un-fused, same math) for correctness checks.
# ----------------------------------------------------------------------------
def _reference(x, g, params):
    n, c, t, h, w = x.shape
    s = t * h * w
    x_flat = x.reshape(n, c, s).astype(jnp.float32)

    def bn(z, q):
        scale = q['gamma'] / jnp.sqrt(q['rv'] + BN_EPS)
        return (z - q['rm'][:, None]) * scale[:, None] + q['beta'][:, None]

    def gate(p):
        pg = _phi_upsample_flat(g, p['wphi'], p['bphi'], (t, h, w))
        th = jnp.einsum('oc,ncs->nos', p['wt'], x_flat)
        f = jnp.maximum(th + pg, 0.0)
        att = jax.nn.sigmoid(jnp.einsum('oc,ncs->nos', p['wp'], f) + p['bp'])
        y = att * x_flat
        wy = jnp.einsum('oc,ncs->nos', p['ww'], y) + p['bw'][:, None]
        return bn(wy, p['bn']), att

    g1, a1 = gate(params['g1'])
    g2, a2 = gate(params['g2'])
    cat = jnp.concatenate([g1, g2], axis=1)
    comb = (jnp.einsum('oc,ncs->nos', params['comb']['wc'], cat)
            + params['comb']['bc'][:, None])
    comb = jnp.maximum(bn(comb, params['comb']['bn']), 0.0)
    out = comb.reshape(n, c, t, h, w)
    att = jnp.concatenate([a1, a2], axis=1).reshape(n, 2, t, h, w)
    return out, att


# ----------------------------------------------------------------------------
# Deterministic parameter construction + demo
# ----------------------------------------------------------------------------
def _make_params(key, c, ci):
    ks = iter(jax.random.split(key, 40))

    def nrm(shape, scale=0.3):
        return scale * jax.random.normal(next(ks), shape, jnp.float32)

    def bn_params():
        return dict(gamma=1.0 + nrm((c,), 0.1), beta=nrm((c,), 0.1),
                    rm=nrm((c,), 0.05), rv=1.0 + jnp.abs(nrm((c,), 0.1)))

    def gate_params():
        return dict(
            wt=nrm((ci, c)),            # theta: conv1x1x1 (in -> inter), no bias
            wphi=nrm((ci, c)),          # phi:   conv1x1x1 (in -> inter), bias
            bphi=nrm((ci,), 0.1),
            wp=nrm((1, ci)),            # psi:   conv1x1x1 (inter -> 1), bias
            bp=nrm((), 0.1),
            ww=nrm((c, c)),             # W:     conv1x1x1 (in -> in), bias
            bw=nrm((c,), 0.1),
            bn=bn_params(),             # eval-mode BatchNorm3d running stats + affine
        )

    return dict(
        g1=gate_params(),
        g2=gate_params(),
        comb=dict(wc=nrm((c, 2 * c)),   # combine_gates conv1x1x1 (2*in -> in)
                  bc=nrm((c,), 0.1),
                  bn=bn_params()),
    )


if __name__ == "__main__":
    key = jax.random.PRNGKey(0)
    kx, kg, kp = jax.random.split(key, 3)

    # in_size=8, inter_size=4; x spatial 16^3, gating spatial 8^3 (sub_sample 2,2,2).
    N, C, Ci = 2, 8, 4
    T = H = W = 16
    Tg = Hg = Wg = 8

    x = jax.random.normal(kx, (N, C, T, H, W), jnp.float32)
    # NOTE: in this module phi's input channels == in_channels, so the gating
    # signal must carry in_channels channels (gate_size is unused by the convs).
    g = jax.random.normal(kg, (N, C, Tg, Hg, Wg), jnp.float32)
    params = _make_params(kp, C, Ci)

    ref_out, ref_att = _reference(x, g, params)

    # f32 I/O: strict correctness check (weights are f32 end-to-end).
    run_f32 = jax.jit(functools.partial(multi_attention_block, io_dtype=jnp.float32))
    out, att = jax.block_until_ready(run_f32(x, g, params))
    assert out.shape == (N, C, T, H, W) and att.shape == (N, 2, T, H, W)
    assert jnp.allclose(out, ref_out, rtol=1e-4, atol=1e-4)
    assert jnp.allclose(att, ref_att, rtol=1e-4, atol=1e-4)

    # Production path: bf16 activations / bf16 MXU operands, f32 accumulation.
    run_bf16 = jax.jit(multi_attention_block)
    out_b, att_b = jax.block_until_ready(run_bf16(x, g, params))
    assert jnp.allclose(out_b.astype(jnp.float32), ref_out, rtol=5e-2, atol=1e-1)
    assert jnp.allclose(att_b.astype(jnp.float32), ref_att, rtol=5e-2, atol=5e-2)

    print("KERNEL_OK")
</pallas_src>

<mosaic_0001>
module attributes {stable_mosaic.version = 11 : i64} {
  func.func private @main(%arg0: i32) attributes {dimension_semantics = [#tpu.dimension_semantics<core_parallel>], iteration_bounds = array<i64: 2>, tpu.core_type = #tpu.core_type<sc_scalar_subcore>, window_params = []} {
    return
  }
}

module attributes {stable_mosaic.version = 11 : i64} {
  func.func private @main(%arg0: i32) attributes {dimension_semantics = [#tpu.dimension_semantics<core_parallel>], iteration_bounds = array<i64: 2>, tpu.core_type = #tpu.core_type<sc_scalar_subcore>, window_params = []} {
    return
  }
}

module attributes {stable_mosaic.version = 11 : i64} {
  func.func @_mab_kernel(%arg0: i32, %arg1: i32, %arg2: memref<1x8x4096xf32, #tpu.memory_space<vmem>>, %arg3: memref<1x8x4096xf32, #tpu.memory_space<vmem>>, %arg4: memref<18x16xf32, #tpu.memory_space<vmem>>, %arg5: memref<10x1xf32, #tpu.memory_space<vmem>>, %arg6: memref<1x8x4096xf32, #tpu.memory_space<vmem>>, %arg7: memref<1x2x4096xf32, #tpu.memory_space<vmem>>) attributes {dimension_semantics = [#tpu.dimension_semantics<parallel>, #tpu.dimension_semantics<parallel>], iteration_bounds = array<i64: 2, 1>, scalar_prefetch = 0 : i64, scratch_operands = 0 : i64, tpu.core_type = #tpu.core_type<tc>, window_params = [{transform_indices = @transform_0, window_bounds = array<i64: 1, 8, 4096>}, {transform_indices = @transform_1, window_bounds = array<i64: 1, 8, 4096>}, {pipeline_mode = #tpu.pipeline_mode<synchronous>, transform_indices = @transform_2, window_bounds = array<i64: 18, 16>}, {pipeline_mode = #tpu.pipeline_mode<synchronous>, transform_indices = @transform_3, window_bounds = array<i64: 10, 1>}, {transform_indices = @transform_4, window_bounds = array<i64: 1, 8, 4096>}, {transform_indices = @transform_5, window_bounds = array<i64: 1, 2, 4096>}]} {
    %c0 = arith.constant 0 : index
    %c0_0 = arith.constant 0 : index
    %0 = vector.load %arg4[%c0, %c0_0] : memref<18x16xf32, #tpu.memory_space<vmem>>, vector<18x16xf32>
    %1 = vector.extract_strided_slice %0 {offsets = [0, 0], sizes = [8, 8], strides = [1, 1]} : vector<18x16xf32> to vector<8x8xf32>
    %2 = vector.extract_strided_slice %0 {offsets = [8, 0], sizes = [2, 8], strides = [1, 1]} : vector<18x16xf32> to vector<2x8xf32>
    %3 = vector.extract_strided_slice %0 {offsets = [10, 0], sizes = [8, 16], strides = [1, 1]} : vector<18x16xf32> to vector<8x16xf32>
    %c0_1 = arith.constant 0 : index
    %c0_2 = arith.constant 0 : index
    %4 = vector.load %arg5[%c0_1, %c0_2] : memref<10x1xf32, #tpu.memory_space<vmem>>, vector<10x1xf32>
    %5 = vector.extract_strided_slice %4 {offsets = [0, 0], sizes = [2, 1], strides = [1, 1]} : vector<10x1xf32> to vector<2x1xf32>
    %6 = vector.extract_strided_slice %4 {offsets = [2, 0], sizes = [8, 1], strides = [1, 1]} : vector<10x1xf32> to vector<8x1xf32>
    %c0_i32 = arith.constant 0 : i32
    %c512_i32 = arith.constant 512 : i32
    %7 = arith.muli %c0_i32, %c512_i32 : i32
    %8 = tpu.assume_multiple %7, 512 : i32
    %c0_3 = arith.constant 0 : index
    %c0_4 = arith.constant 0 : index
    %9 = arith.index_cast %8 : i32 to index
    %10 = vector.load %arg2[%c0_3, %c0_4, %9] : memref<1x8x4096xf32, #tpu.memory_space<vmem>>, vector<1x8x512xf32>
    %11 = vector.shape_cast %10 : vector<1x8x512xf32> to vector<8x512xf32>
    %c0_5 = arith.constant 0 : index
    %c0_6 = arith.constant 0 : index
    %12 = arith.index_cast %8 : i32 to index
    %13 = vector.load %arg3[%c0_5, %c0_6, %12] : memref<1x8x4096xf32, #tpu.memory_space<vmem>>, vector<1x8x512xf32>
    %14 = vector.shape_cast %13 : vector<1x8x512xf32> to vector<8x512xf32>
    %cst = arith.constant dense<0.000000e+00> : vector<8x512xf32>
    %15 = tpu.matmul %1, %11, %cst {dimension_numbers = #tpu.dot_dimension_numbers<[1], [0], [0], [1], [0, 0, 1, 1], [], []>} : vector<8x8xf32>, vector<8x512xf32>, vector<8x512xf32> -> vector<8x512xf32>
    %16 = arith.addf %15, %14 : vector<8x512xf32>
    %cst_7 = arith.constant 0.000000e+00 : f32
    %17 = vector.broadcast %cst_7 : f32 to vector<8x512xf32>
    %18 = arith.maximumf %16, %17 : vector<8x512xf32>
    %cst_8 = arith.constant dense<0.000000e+00> : vector<2x512xf32>
    %19 = tpu.matmul %2, %18, %cst_8 {dimension_numbers = #tpu.dot_dimension_numbers<[1], [0], [0], [1], [0, 0, 1, 1], [], []>} : vector<2x8xf32>, vector<8x512xf32>, vector<2x512xf32> -> vector<2x512xf32>
    %20 = vector.broadcast %5 : vector<2x1xf32> to vector<2x512xf32>
    %21 = arith.addf %19, %20 : vector<2x512xf32>
    %22 = arith.negf %21 : vector<2x512xf32>
    %23 = math.exp %22 : vector<2x512xf32>
    %cst_9 = arith.constant 1.000000e+00 : f32
    %24 = vector.broadcast %cst_9 : f32 to vector<2x512xf32>
    %25 = arith.addf %24, %23 : vector<2x512xf32>
    %26 = arith.divf %24, %25 : vector<2x512xf32>
    %27 = vector.extract_strided_slice %26 {offsets = [0, 0], sizes = [1, 512], strides = [1, 1]} : vector<2x512xf32> to vector<1x512xf32>
    %28 = vector.broadcast %27 : vector<1x512xf32> to vector<8x512xf32>
    %29 = arith.mulf %28, %11 : vector<8x512xf32>
    %30 = vector.extract_strided_slice %26 {offsets = [1, 0], sizes = [1, 512], strides = [1, 1]} : vector<2x512xf32> to vector<1x512xf32>
    %31 = vector.broadcast %30 : vector<1x512xf32> to vector<8x512xf32>
    %32 = arith.mulf %31, %11 : vector<8x512xf32>
    %33 = tpu.concatenate %29, %32 in 0 : vector<8x512xf32>, vector<8x512xf32> -> vector<16x512xf32>
    %cst_10 = arith.constant dense<0.000000e+00> : vector<8x512xf32>
    %34 = tpu.matmul %3, %33, %cst_10 {dimension_numbers = #tpu.dot_dimension_numbers<[1], [0], [0], [1], [0, 0, 1, 1], [], []>} : vector<8x16xf32>, vector<16x512xf32>, vector<8x512xf32> -> vector<8x512xf32>
    %35 = vector.broadcast %6 : vector<8x1xf32> to vector<8x512xf32>
    %36 = arith.addf %34, %35 : vector<8x512xf32>
    %cst_11 = arith.constant 0.000000e+00 : f32
    %37 = vector.broadcast %cst_11 : f32 to vector<8x512xf32>
    %38 = arith.maximumf %36, %37 : vector<8x512xf32>
    %c0_12 = arith.constant 0 : index
    %c0_13 = arith.constant 0 : index
    %39 = arith.index_cast %8 : i32 to index
    %40 = vector.load %arg6[%c0_12, %c0_13, %39] : memref<1x8x4096xf32, #tpu.memory_space<vmem>>, vector<1x8x512xf32>
    %41 = vector.shape_cast %40 : vector<1x8x512xf32> to vector<8x512xf32>
    %42 = vector.shape_cast %38 : vector<8x512xf32> to vector<1x8x512xf32>
    tpu.vector_store %arg6[%c0_12, %c0_13, %39], %42 {strides = array<i32>} : memref<1x8x4096xf32, #tpu.memory_space<vmem>>, vector<1x8x512xf32>,
    %c0_14 = arith.constant 0 : index
    %c0_15 = arith.constant 0 : index
    %43 = arith.index_cast %8 : i32 to index
    %44 = vector.load %arg7[%c0_14, %c0_15, %43] : memref<1x2x4096xf32, #tpu.memory_space<vmem>>, vector<1x2x512xf32>
    %45 = vector.shape_cast %44 : vector<1x2x512xf32> to vector<2x512xf32>
    %46 = vector.shape_cast %26 : vector<2x512xf32> to vector<1x2x512xf32>
    tpu.vector_store %arg7[%c0_14, %c0_15, %43], %46 {strides = array<i32>} : memref<1x2x4096xf32, #tpu.memory_space<vmem>>, vector<1x2x512xf32>,
    %c1_i32 = arith.constant 1 : i32
    %c512_i32_16 = arith.constant 512 : i32
    %47 = arith.muli %c1_i32, %c512_i32_16 : i32
    %48 = tpu.assume_multiple %47, 512 : i32
    %c0_17 = arith.constant 0 : index
    %c0_18 = arith.constant 0 : index
    %49 = arith.index_cast %48 : i32 to index
    %50 = vector.load %arg2[%c0_17, %c0_18, %49] : memref<1x8x4096xf32, #tpu.memory_space<vmem>>, vector<1x8x512xf32>
    %51 = vector.shape_cast %50 : vector<1x8x512xf32> to vector<8x512xf32>
    %c0_19 = arith.constant 0 : index
    %c0_20 = arith.constant 0 : index
    %52 = arith.index_cast %48 : i32 to index
    %53 = vector.load %arg3[%c0_19, %c0_20, %52] : memref<1x8x4096xf32, #tpu.memory_space<vmem>>, vector<1x8x512xf32>
    %54 = vector.shape_cast %53 : vector<1x8x512xf32> to vector<8x512xf32>
    %cst_21 = arith.constant dense<0.000000e+00> : vector<8x512xf32>
    %55 = tpu.matmul %1, %51, %cst_21 {dimension_numbers = #tpu.dot_dimension_numbers<[1], [0], [0], [1], [0, 0, 1, 1], [], []>} : vector<8x8xf32>, vector<8x512xf32>, vector<8x512xf32> -> vector<8x512xf32>
    %56 = arith.addf %55, %54 : vector<8x512xf32>
    %cst_22 = arith.constant 0.000000e+00 : f32
    %57 = vector.broadcast %cst_22 : f32 to vector<8x512xf32>
    %58 = arith.maximumf %56, %57 : vector<8x512xf32>
    %cst_23 = arith.constant dense<0.000000e+00> : vector<2x512xf32>
    %59 = tpu.matmul %2, %58, %cst_23 {dimension_numbers = #tpu.dot_dimension_numbers<[1], [0], [0], [1], [0, 0, 1, 1], [], []>} : vector<2x8xf32>, vector<8x512xf32>, vector<2x512xf32> -> vector<2x512xf32>
    %60 = vector.broadcast %5 : vector<2x1xf32> to vector<2x512xf32>
    %61 = arith.addf %59, %60 : vector<2x512xf32>
    %62 = arith.negf %61 : vector<2x512xf32>
    %63 = math.exp %62 : vector<2x512xf32>
    %cst_24 = arith.constant 1.000000e+00 : f32
    %64 = vector.broadcast %cst_24 : f32 to vector<2x512xf32>
    %65 = arith.addf %64, %63 : vector<2x512xf32>
    %66 = arith.divf %64, %65 : vector<2x512xf32>
    %67 = vector.extract_strided_slice %66 {offsets = [0, 0], sizes = [1, 512], strides = [1, 1]} : vector<2x512xf32> to vector<1x512xf32>
    %68 = vector.broadcast %67 : vector<1x512xf32> to vector<8x512xf32>
    %69 = arith.mulf %68, %51 : vector<8x512xf32>
    %70 = vector.extract_strided_slice %66 {offsets = [1, 0], sizes = [1, 512], strides = [1, 1]} : vector<2x512xf32> to vector<1x512xf32>
    %71 = vector.broadcast %70 : vector<1x512xf32> to vector<8x512xf32>
    %72 = arith.mulf %71, %51 : vector<8x512xf32>
    %73 = tpu.concatenate %69, %72 in 0 : vector<8x512xf32>, vector<8x512xf32> -> vector<16x512xf32>
    %cst_25 = arith.constant dense<0.000000e+00> : vector<8x512xf32>
    %74 = tpu.matmul %3, %73, %cst_25 {dimension_numbers = #tpu.dot_dimension_numbers<[1], [0], [0], [1], [0, 0, 1, 1], [], []>} : vector<8x16xf32>, vector<16x512xf32>, vector<8x512xf32> -> vector<8x512xf32>
    %75 = vector.broadcast %6 : vector<8x1xf32> to vector<8x512xf32>
    %76 = arith.addf %74, %75 : vector<8x512xf32>
    %cst_26 = arith.constant 0.000000e+00 : f32
    %77 = vector.broadcast %cst_26 : f32 to vector<8x512xf32>
    %78 = arith.maximumf %76, %77 : vector<8x512xf32>
    %c0_27 = arith.constant 0 : index
    %c0_28 = arith.constant 0 : index
    %79 = arith.index_cast %48 : i32 to index
    %80 = vector.load %arg6[%c0_27, %c0_28, %79] : memref<1x8x4096xf32, #tpu.memory_space<vmem>>, vector<1x8x512xf32>
    %81 = vector.shape_cast %80 : vector<1x8x512xf32> to vector<8x512xf32>
    %82 = vector.shape_cast %78 : vector<8x512xf32> to vector<1x8x512xf32>
    tpu.vector_store %arg6[%c0_27, %c0_28, %79], %82 {strides = array<i32>} : memref<1x8x4096xf32, #tpu.memory_space<vmem>>, vector<1x8x512xf32>,
    %c0_29 = arith.constant 0 : index
    %c0_30 = arith.constant 0 : index
    %83 = arith.index_cast %48 : i32 to index
    %84 = vector.load %arg7[%c0_29, %c0_30, %83] : memref<1x2x4096xf32, #tpu.memory_space<vmem>>, vector<1x2x512xf32>
    %85 = vector.shape_cast %84 : vector<1x2x512xf32> to vector<2x512xf32>
    %86 = vector.shape_cast %66 : vector<2x512xf32> to vector<1x2x512xf32>
    tpu.vector_store %arg7[%c0_29, %c0_30, %83], %86 {strides = array<i32>} : memref<1x2x4096xf32, #tpu.memory_space<vmem>>, vector<1x2x512xf32>,
    %c2_i32 = arith.constant 2 : i32
    %c512_i32_31 = arith.constant 512 : i32
    %87 = arith.muli %c2_i32, %c512_i32_31 : i32
    %88 = tpu.assume_multiple %87, 512 : i32
    %c0_32 = arith.constant 0 : index
    %c0_33 = arith.constant 0 : index
    %89 = arith.index_cast %88 : i32 to index
    %90 = vector.load %arg2[%c0_32, %c0_33, %89] : memref<1x8x4096xf32, #tpu.memory_space<vmem>>, vector<1x8x512xf32>
    %91 = vector.shape_cast %90 : vector<1x8x512xf32> to vector<8x512xf32>
    %c0_34 = arith.constant 0 : index
    %c0_35 = arith.constant 0 : index
    %92 = arith.index_cast %88 : i32 to index
    %93 = vector.load %arg3[%c0_34, %c0_35, %92] : memref<1x8x4096xf32, #tpu.memory_space<vmem>>, vector<1x8x512xf32>
    %94 = vector.shape_cast %93 : vector<1x8x512xf32> to vector<8x512xf32>
    %cst_36 = arith.constant dense<0.000000e+00> : vector<8x512xf32>
    %95 = tpu.matmul %1, %91, %cst_36 {dimension_numbers = #tpu.dot_dimension_numbers<[1], [0], [0], [1], [0, 0, 1, 1], [], []>} : vector<8x8xf32>, vector<8x512xf32>, vector<8x512xf32> -> vector<8x512xf32>
    %96 = arith.addf %95, %94 : vector<8x512xf32>
    %cst_37 = arith.constant 0.000000e+00 : f32
    %97 = vector.broadcast %cst_37 : f32 to vector<8x512xf32>
    %98 = arith.maximumf %96, %97 : vector<8x512xf32>
    %cst_38 = arith.constant dense<0.000000e+00> : vector<2x512xf32>
    %99 = tpu.matmul %2, %98, %cst_38 {dimension_numbers = #tpu.dot_dimension_numbers<[1], [0], [0], [1], [0, 0, 1, 1], [], []>} : vector<2x8xf32>, vector<8x512xf32>, vector<2x512xf32> -> vector<2x512xf32>
    %100 = vector.broadcast %5 : vector<2x1xf32> to vector<2x512xf32>
    %101 = arith.addf %99, %100 : vector<2x512xf32>
    %102 = arith.negf %101 : vector<2x512xf32>
    %103 = math.exp %102 : vector<2x512xf32>
    %cst_39 = arith.constant 1.000000e+00 : f32
    %104 = vector.broadcast %cst_39 : f32 to vector<2x512xf32>
    %105 = arith.addf %104, %103 : vector<2x512xf32>
    %106 = arith.divf %104, %105 : vector<2x512xf32>
    %107 = vector.extract_strided_slice %106 {offsets = [0, 0], sizes = [1, 512], strides = [1, 1]} : vector<2x512xf32> to vector<1x512xf32>
    %108 = vector.broadcast %107 : vector<1x512xf32> to vector<8x512xf32>
    %109 = arith.mulf %108, %91 : vector<8x512xf32>
    %110 = vector.extract_strided_slice %106 {offsets = [1, 0], sizes = [1, 512], strides = [1, 1]} : vector<2x512xf32> to vector<1x512xf32>
    %111 = vector.broadcast %110 : vector<1x512xf32> to vector<8x512xf32>
    %112 = arith.mulf %111, %91 : vector<8x512xf32>
    %113 = tpu.concatenate %109, %112 in 0 : vector<8x512xf32>, vector<8x512xf32> -> vector<16x512xf32>
    %cst_40 = arith.constant dense<0.000000e+00> : vector<8x512xf32>
    %114 = tpu.matmul %3, %113, %cst_40 {dimension_numbers = #tpu.dot_dimension_numbers<[1], [0], [0], [1], [0, 0, 1, 1], [], []>} : vector<8x16xf32>, vector<16x512xf32>, vector<8x512xf32> -> vector<8x512xf32>
    %115 = vector.broadcast %6 : vector<8x1xf32> to vector<8x512xf32>
    %116 = arith.addf %114, %115 : vector<8x512xf32>
    %cst_41 = arith.constant 0.000000e+00 : f32
    %117 = vector.broadcast %cst_41 : f32 to vector<8x512xf32>
    %118 = arith.maximumf %116, %117 : vector<8x512xf32>
    %c0_42 = arith.constant 0 : index
    %c0_43 = arith.constant 0 : index
    %119 = arith.index_cast %88 : i32 to index
    %120 = vector.load %arg6[%c0_42, %c0_43, %119] : memref<1x8x4096xf32, #tpu.memory_space<vmem>>, vector<1x8x512xf32>
    %121 = vector.shape_cast %120 : vector<1x8x512xf32> to vector<8x512xf32>
    %122 = vector.shape_cast %118 : vector<8x512xf32> to vector<1x8x512xf32>
    tpu.vector_store %arg6[%c0_42, %c0_43, %119], %122 {strides = array<i32>} : memref<1x8x4096xf32, #tpu.memory_space<vmem>>, vector<1x8x512xf32>,
    %c0_44 = arith.constant 0 : index
    %c0_45 = arith.constant 0 : index
    %123 = arith.index_cast %88 : i32 to index
    %124 = vector.load %arg7[%c0_44, %c0_45, %123] : memref<1x2x4096xf32, #tpu.memory_space<vmem>>, vector<1x2x512xf32>
    %125 = vector.shape_cast %124 : vector<1x2x512xf32> to vector<2x512xf32>
    %126 = vector.shape_cast %106 : vector<2x512xf32> to vector<1x2x512xf32>
    tpu.vector_store %arg7[%c0_44, %c0_45, %123], %126 {strides = array<i32>} : memref<1x2x4096xf32, #tpu.memory_space<vmem>>, vector<1x2x512xf32>,
    %c3_i32 = arith.constant 3 : i32
    %c512_i32_46 = arith.constant 512 : i32
    %127 = arith.muli %c3_i32, %c512_i32_46 : i32
    %128 = tpu.assume_multiple %127, 512 : i32
    %c0_47 = arith.constant 0 : index
    %c0_48 = arith.constant 0 : index
    %129 = arith.index_cast %128 : i32 to index
    %130 = vector.load %arg2[%c0_47, %c0_48, %129] : memref<1x8x4096xf32, #tpu.memory_space<vmem>>, vector<1x8x512xf32>
    %131 = vector.shape_cast %130 : vector<1x8x512xf32> to vector<8x512xf32>
    %c0_49 = arith.constant 0 : index
    %c0_50 = arith.constant 0 : index
    %132 = arith.index_cast %128 : i32 to index
    %133 = vector.load %arg3[%c0_49, %c0_50, %132] : memref<1x8x4096xf32, #tpu.memory_space<vmem>>, vector<1x8x512xf32>
    %134 = vector.shape_cast %133 : vector<1x8x512xf32> to vector<8x512xf32>
    %cst_51 = arith.constant dense<0.000000e+00> : vector<8x512xf32>
    %135 = tpu.matmul %1, %131, %cst_51 {dimension_numbers = #tpu.dot_dimension_numbers<[1], [0], [0], [1], [0, 0, 1, 1], [], []>} : vector<8x8xf32>, vector<8x512xf32>, vector<8x512xf32> -> vector<8x512xf32>
    %136 = arith.addf %135, %134 : vector<8x512xf32>
    %cst_52 = arith.constant 0.000000e+00 : f32
    %137 = vector.broadcast %cst_52 : f32 to vector<8x512xf32>
    %138 = arith.maximumf %136, %137 : vector<8x512xf32>
    %cst_53 = arith.constant dense<0.000000e+00> : vector<2x512xf32>
    %139 = tpu.matmul %2, %138, %cst_53 {dimension_numbers = #tpu.dot_dimension_numbers<[1], [0], [0], [1], [0, 0, 1, 1], [], []>} : vector<2x8xf32>, vector<8x512xf32>, vector<2x512xf32> -> vector<2x512xf32>
    %140 = vector.broadcast %5 : vector<2x1xf32> to vector<2x512xf32>
    %141 = arith.addf %139, %140 : vector<2x512xf32>
    %142 = arith.negf %141 : vector<2x512xf32>
    %143 = math.exp %142 : vector<2x512xf32>
    %cst_54 = arith.constant 1.000000e+00 : f32
    %144 = vector.broadcast %cst_54 : f32 to vector<2x512xf32>
    %145 = arith.addf %144, %143 : vector<2x512xf32>
    %146 = arith.divf %144, %145 : vector<2x512xf32>
    %147 = vector.extract_strided_slice %146 {offsets = [0, 0], sizes = [1, 512], strides = [1, 1]} : vector<2x512xf32> to vector<1x512xf32>
    %148 = vector.broadcast %147 : vector<1x512xf32> to vector<8x512xf32>
    %149 = arith.mulf %148, %131 : vector<8x512xf32>
    %150 = vector.extract_strided_slice %146 {offsets = [1, 0], sizes = [1, 512], strides = [1, 1]} : vector<2x512xf32> to vector<1x512xf32>
    %151 = vector.broadcast %150 : vector<1x512xf32> to vector<8x512xf32>
    %152 = arith.mulf %151, %131 : vector<8x512xf32>
    %153 = tpu.concatenate %149, %152 in 0 : vector<8x512xf32>, vector<8x512xf32> -> vector<16x512xf32>
    %cst_55 = arith.constant dense<0.000000e+00> : vector<8x512xf32>
    %154 = tpu.matmul %3, %153, %cst_55 {dimension_numbers = #tpu.dot_dimension_numbers<[1], [0], [0], [1], [0, 0, 1, 1], [], []>} : vector<8x16xf32>, vector<16x512xf32>, vector<8x512xf32> -> vector<8x512xf32>
    %155 = vector.broadcast %6 : vector<8x1xf32> to vector<8x512xf32>
    %156 = arith.addf %154, %155 : vector<8x512xf32>
    %cst_56 = arith.constant 0.000000e+00 : f32
    %157 = vector.broadcast %cst_56 : f32 to vector<8x512xf32>
    %158 = arith.maximumf %156, %157 : vector<8x512xf32>
    %c0_57 = arith.constant 0 : index
    %c0_58 = arith.constant 0 : index
    %159 = arith.index_cast %128 : i32 to index
    %160 = vector.load %arg6[%c0_57, %c0_58, %159] : memref<1x8x4096xf32, #tpu.memory_space<vmem>>, vector<1x8x512xf32>
    %161 = vector.shape_cast %160 : vector<1x8x512xf32> to vector<8x512xf32>
    %162 = vector.shape_cast %158 : vector<8x512xf32> to vector<1x8x512xf32>
    tpu.vector_store %arg6[%c0_57, %c0_58, %159], %162 {strides = array<i32>} : memref<1x8x4096xf32, #tpu.memory_space<vmem>>, vector<1x8x512xf32>,
    %c0_59 = arith.constant 0 : index
    %c0_60 = arith.constant 0 : index
    %163 = arith.index_cast %128 : i32 to index
    %164 = vector.load %arg7[%c0_59, %c0_60, %163] : memref<1x2x4096xf32, #tpu.memory_space<vmem>>, vector<1x2x512xf32>
    %165 = vector.shape_cast %164 : vector<1x2x512xf32> to vector<2x512xf32>
    %166 = vector.shape_cast %146 : vector<2x512xf32> to vector<1x2x512xf32>
    tpu.vector_store %arg7[%c0_59, %c0_60, %163], %166 {strides = array<i32>} : memref<1x2x4096xf32, #tpu.memory_space<vmem>>, vector<1x2x512xf32>,
    %c4_i32 = arith.constant 4 : i32
    %c512_i32_61 = arith.constant 512 : i32
    %167 = arith.muli %c4_i32, %c512_i32_61 : i32
    %168 = tpu.assume_multiple %167, 512 : i32
    %c0_62 = arith.constant 0 : index
    %c0_63 = arith.constant 0 : index
    %169 = arith.index_cast %168 : i32 to index
    %170 = vector.load %arg2[%c0_62, %c0_63, %169] : memref<1x8x4096xf32, #tpu.memory_space<vmem>>, vector<1x8x512xf32>
    %171 = vector.shape_cast %170 : vector<1x8x512xf32> to vector<8x512xf32>
    %c0_64 = arith.constant 0 : index
    %c0_65 = arith.constant 0 : index
    %172 = arith.index_cast %168 : i32 to index
    %173 = vector.load %arg3[%c0_64, %c0_65, %172] : memref<1x8x4096xf32, #tpu.memory_space<vmem>>, vector<1x8x512xf32>
    %174 = vector.shape_cast %173 : vector<1x8x512xf32> to vector<8x512xf32>
    %cst_66 = arith.constant dense<0.000000e+00> : vector<8x512xf32>
    %175 = tpu.matmul %1, %171, %cst_66 {dimension_numbers = #tpu.dot_dimension_numbers<[1], [0], [0], [1], [0, 0, 1, 1], [], []>} : vector<8x8xf32>, vector<8x512xf32>, vector<8x512xf32> -> vector<8x512xf32>
    %176 = arith.addf %175, %174 : vector<8x512xf32>
    %cst_67 = arith.constant 0.000000e+00 : f32
    %177 = vector.broadcast %cst_67 : f32 to vector<8x512xf32>
    %178 = arith.maximumf %176, %177 : vector<8x512xf32>
    %cst_68 = arith.constant dense<0.000000e+00> : vector<2x512xf32>
    %179 = tpu.matmul %2, %178, %cst_68 {dimension_numbers = #tpu.dot_dimension_numbers<[1], [0], [0], [1], [0, 0, 1, 1], [], []>} : vector<2x8xf32>, vector<8x512xf32>, vector<2x512xf32> -> vector<2x512xf32>
    %180 = vector.broadcast %5 : vector<2x1xf32> to vector<2x512xf32>
    %181 = arith.addf %179, %180 : vector<2x512xf32>
    %182 = arith.negf %181 : vector<2x512xf32>
    %183 = math.exp %182 : vector<2x512xf32>
    %cst_69 = arith.constant 1.000000e+00 : f32
    %184 = vector.broadcast %cst_69 : f32 to vector<2x512xf32>
    %185 = arith.addf %184, %183 : vector<2x512xf32>
    %186 = arith.divf %184, %185 : vector<2x512xf32>
    %187 = vector.extract_strided_slice %186 {offsets = [0, 0], sizes = [1, 512], strides = [1, 1]} : vector<2x512xf32> to vector<1x512xf32>
    %188 = vector.broadcast %187 : vector<1x512xf32> to vector<8x512xf32>
    %189 = arith.mulf %188, %171 : vector<8x512xf32>
    %190 = vector.extract_strided_slice %186 {offsets = [1, 0], sizes = [1, 512], strides = [1, 1]} : vector<2x512xf32> to vector<1x512xf32>
    %191 = vector.broadcast %190 : vector<1x512xf32> to vector<8x512xf32>
    %192 = arith.mulf %191, %171 : vector<8x512xf32>
    %193 = tpu.concatenate %189, %192 in 0 : vector<8x512xf32>, vector<8x512xf32> -> vector<16x512xf32>
    %cst_70 = arith.constant dense<0.000000e+00> : vector<8x512xf32>
    %194 = tpu.matmul %3, %193, %cst_70 {dimension_numbers = #tpu.dot_dimension_numbers<[1], [0], [0], [1], [0, 0, 1, 1], [], []>} : vector<8x16xf32>, vector<16x512xf32>, vector<8x512xf32> -> vector<8x512xf32>
    %195 = vector.broadcast %6 : vector<8x1xf32> to vector<8x512xf32>
    %196 = arith.addf %194, %195 : vector<8x512xf32>
    %cst_71 = arith.constant 0.000000e+00 : f32
    %197 = vector.broadcast %cst_71 : f32 to vector<8x512xf32>
    %198 = arith.maximumf %196, %197 : vector<8x512xf32>
    %c0_72 = arith.constant 0 : index
    %c0_73 = arith.constant 0 : index
    %199 = arith.index_cast %168 : i32 to index
    %200 = vector.load %arg6[%c0_72, %c0_73, %199] : memref<1x8x4096xf32, #tpu.memory_space<vmem>>, vector<1x8x512xf32>
    %201 = vector.shape_cast %200 : vector<1x8x512xf32> to vector<8x512xf32>
    %202 = vector.shape_cast %198 : vector<8x512xf32> to vector<1x8x512xf32>
    tpu.vector_store %arg6[%c0_72, %c0_73, %199], %202 {strides = array<i32>} : memref<1x8x4096xf32, #tpu.memory_space<vmem>>, vector<1x8x512xf32>,
    %c0_74 = arith.constant 0 : index
    %c0_75 = arith.constant 0 : index
    %203 = arith.index_cast %168 : i32 to index
    %204 = vector.load %arg7[%c0_74, %c0_75, %203] : memref<1x2x4096xf32, #tpu.memory_space<vmem>>, vector<1x2x512xf32>
    %205 = vector.shape_cast %204 : vector<1x2x512xf32> to vector<2x512xf32>
    %206 = vector.shape_cast %186 : vector<2x512xf32> to vector<1x2x512xf32>
    tpu.vector_store %arg7[%c0_74, %c0_75, %203], %206 {strides = array<i32>} : memref<1x2x4096xf32, #tpu.memory_space<vmem>>, vector<1x2x512xf32>,
    %c5_i32 = arith.constant 5 : i32
    %c512_i32_76 = arith.constant 512 : i32
    %207 = arith.muli %c5_i32, %c512_i32_76 : i32
    %208 = tpu.assume_multiple %207, 512 : i32
    %c0_77 = arith.constant 0 : index
    %c0_78 = arith.constant 0 : index
    %209 = arith.index_cast %208 : i32 to index
    %210 = vector.load %arg2[%c0_77, %c0_78, %209] : memref<1x8x4096xf32, #tpu.memory_space<vmem>>, vector<1x8x512xf32>
    %211 = vector.shape_cast %210 : vector<1x8x512xf32> to vector<8x512xf32>
    %c0_79 = arith.constant 0 : index
    %c0_80 = arith.constant 0 : index
    %212 = arith.index_cast %208 : i32 to index
    %213 = vector.load %arg3[%c0_79, %c0_80, %212] : memref<1x8x4096xf32, #tpu.memory_space<vmem>>, vector<1x8x512xf32>
    %214 = vector.shape_cast %213 : vector<1x8x512xf32> to vector<8x512xf32>
    %cst_81 = arith.constant dense<0.000000e+00> : vector<8x512xf32>
    %215 = tpu.matmul %1, %211, %cst_81 {dimension_numbers = #tpu.dot_dimension_numbers<[1], [0], [0], [1], [0, 0, 1, 1], [], []>} : vector<8x8xf32>, vector<8x512xf32>, vector<8x512xf32> -> vector<8x512xf32>
    %216 = arith.addf %215, %214 : vector<8x512xf32>
    %cst_82 = arith.constant 0.000000e+00 : f32
    %217 = vector.broadcast %cst_82 : f32 to vector<8x512xf32>
    %218 = arith.maximumf %216, %217 : vector<8x512xf32>
    %cst_83 = arith.constant dense<0.000000e+00> : vector<2x512xf32>
    %219 = tpu.matmul %2, %218, %cst_83 {dimension_numbers = #tpu.dot_dimension_numbers<[1], [0], [0], [1], [0, 0, 1, 1], [], []>} : vector<2x8xf32>, vector<8x512xf32>, vector<2x512xf32> -> vector<2x512xf32>
    %220 = vector.broadcast %5 : vector<2x1xf32> to vector<2x512xf32>
    %221 = arith.addf %219, %220 : vector<2x512xf32>
    %222 = arith.negf %221 : vector<2x512xf32>
    %223 = math.exp %222 : vector<2x512xf32>
    %cst_84 = arith.constant 1.000000e+00 : f32
    %224 = vector.broadcast %cst_84 : f32 to vector<2x512xf32>
    %225 = arith.addf %224, %223 : vector<2x512xf32>
    %226 = arith.divf %224, %225 : vector<2x512xf32>
    %227 = vector.extract_strided_slice %226 {offsets = [0, 0], sizes = [1, 512], strides = [1, 1]} : vector<2x512xf32> to vector<1x512xf32>
    %228 = vector.broadcast %227 : vector<1x512xf32> to vector<8x512xf32>
    %229 = arith.mulf %228, %211 : vector<8x512xf32>
    %230 = vector.extract_strided_slice %226 {offsets = [1, 0], sizes = [1, 512], strides = [1, 1]} : vector<2x512xf32> to vector<1x512xf32>
    %231 = vector.broadcast %230 : vector<1x512xf32> to vector<8x512xf32>
    %232 = arith.mulf %231, %211 : vector<8x512xf32>
    %233 = tpu.concatenate %229, %232 in 0 : vector<8x512xf32>, vector<8x512xf32> -> vector<16x512xf32>
    %cst_85 = arith.constant dense<0.000000e+00> : vector<8x512xf32>
    %234 = tpu.matmul %3, %233, %cst_85 {dimension_numbers = #tpu.dot_dimension_numbers<[1], [0], [0], [1], [0, 0, 1, 1], [], []>} : vector<8x16xf32>, vector<16x512xf32>, vector<8x512xf32> -> vector<8x512xf32>
    %235 = vector.broadcast %6 : vector<8x1xf32> to vector<8x512xf32>
    %236 = arith.addf %234, %235 : vector<8x512xf32>
    %cst_86 = arith.constant 0.000000e+00 : f32
    %237 = vector.broadcast %cst_86 : f32 to vector<8x512xf32>
    %238 = arith.maximumf %236, %237 : vector<8x512xf32>
    %c0_87 = arith.constant 0 : index
    %c0_88 = arith.constant 0 : index
    %239 = arith.index_cast %208 : i32 to index
    %240 = vector.load %arg6[%c0_87, %c0_88, %239] : memref<1x8x4096xf32, #tpu.memory_space<vmem>>, vector<1x8x512xf32>
    %241 = vector.shape_cast %240 : vector<1x8x512xf32> to vector<8x512xf32>
    %242 = vector.shape_cast %238 : vector<8x512xf32> to vector<1x8x512xf32>
    tpu.vector_store %arg6[%c0_87, %c0_88, %239], %242 {strides = array<i32>} : memref<1x8x4096xf32, #tpu.memory_space<vmem>>, vector<1x8x512xf32>,
    %c0_89 = arith.constant 0 : index
    %c0_90 = arith.constant 0 : index
    %243 = arith.index_cast %208 : i32 to index
    %244 = vector.load %arg7[%c0_89, %c0_90, %243] : memref<1x2x4096xf32, #tpu.memory_space<vmem>>, vector<1x2x512xf32>
    %245 = vector.shape_cast %244 : vector<1x2x512xf32> to vector<2x512xf32>
    %246 = vector.shape_cast %226 : vector<2x512xf32> to vector<1x2x512xf32>
    tpu.vector_store %arg7[%c0_89, %c0_90, %243], %246 {strides = array<i32>} : memref<1x2x4096xf32, #tpu.memory_space<vmem>>, vector<1x2x512xf32>,
    %c6_i32 = arith.constant 6 : i32
    %c512_i32_91 = arith.constant 512 : i32
    %247 = arith.muli %c6_i32, %c512_i32_91 : i32
    %248 = tpu.assume_multiple %247, 512 : i32
    %c0_92 = arith.constant 0 : index
    %c0_93 = arith.constant 0 : index
    %249 = arith.index_cast %248 : i32 to index
    %250 = vector.load %arg2[%c0_92, %c0_93, %249] : memref<1x8x4096xf32, #tpu.memory_space<vmem>>, vector<1x8x512xf32>
    %251 = vector.shape_cast %250 : vector<1x8x512xf32> to vector<8x512xf32>
    %c0_94 = arith.constant 0 : index
    %c0_95 = arith.constant 0 : index
    %252 = arith.index_cast %248 : i32 to index
    %253 = vector.load %arg3[%c0_94, %c0_95, %252] : memref<1x8x4096xf32, #tpu.memory_space<vmem>>, vector<1x8x512xf32>
    %254 = vector.shape_cast %253 : vector<1x8x512xf32> to vector<8x512xf32>
    %cst_96 = arith.constant dense<0.000000e+00> : vector<8x512xf32>
    %255 = tpu.matmul %1, %251, %cst_96 {dimension_numbers = #tpu.dot_dimension_numbers<[1], [0], [0], [1], [0, 0, 1, 1], [], []>} : vector<8x8xf32>, vector<8x512xf32>, vector<8x512xf32> -> vector<8x512xf32>
    %256 = arith.addf %255, %254 : vector<8x512xf32>
    %cst_97 = arith.constant 0.000000e+00 : f32
    %257 = vector.broadcast %cst_97 : f32 to vector<8x512xf32>
    %258 = arith.maximumf %256, %257 : vector<8x512xf32>
    %cst_98 = arith.constant dense<0.000000e+00> : vector<2x512xf32>
    %259 = tpu.matmul %2, %258, %cst_98 {dimension_numbers = #tpu.dot_dimension_numbers<[1], [0], [0], [1], [0, 0, 1, 1], [], []>} : vector<2x8xf32>, vector<8x512xf32>, vector<2x512xf32> -> vector<2x512xf32>
    %260 = vector.broadcast %5 : vector<2x1xf32> to vector<2x512xf32>
    %261 = arith.addf %259, %260 : vector<2x512xf32>
    %262 = arith.negf %261 : vector<2x512xf32>
    %263 = math.exp %262 : vector<2x512xf32>
    %cst_99 = arith.constant 1.000000e+00 : f32
    %264 = vector.broadcast %cst_99 : f32 to vector<2x512xf32>
    %265 = arith.addf %264, %263 : vector<2x512xf32>
    %266 = arith.divf %264, %265 : vector<2x512xf32>
    %267 = vector.extract_strided_slice %266 {offsets = [0, 0], sizes = [1, 512], strides = [1, 1]} : vector<2x512xf32> to vector<1x512xf32>
    %268 = vector.broadcast %267 : vector<1x512xf32> to vector<8x512xf32>
    %269 = arith.mulf %268, %251 : vector<8x512xf32>
    %270 = vector.extract_strided_slice %266 {offsets = [1, 0], sizes = [1, 512], strides = [1, 1]} : vector<2x512xf32> to vector<1x512xf32>
    %271 = vector.broadcast %270 : vector<1x512xf32> to vector<8x512xf32>
    %272 = arith.mulf %271, %251 : vector<8x512xf32>
    %273 = tpu.concatenate %269, %272 in 0 : vector<8x512xf32>, vector<8x512xf32> -> vector<16x512xf32>
    %cst_100 = arith.constant dense<0.000000e+00> : vector<8x512xf32>
    %274 = tpu.matmul %3, %273, %cst_100 {dimension_numbers = #tpu.dot_dimension_numbers<[1], [0], [0], [1], [0, 0, 1, 1], [], []>} : vector<8x16xf32>, vector<16x512xf32>, vector<8x512xf32> -> vector<8x512xf32>
    %275 = vector.broadcast %6 : vector<8x1xf32> to vector<8x512xf32>
    %276 = arith.addf %274, %275 : vector<8x512xf32>
    %cst_101 = arith.constant 0.000000e+00 : f32
    %277 = vector.broadcast %cst_101 : f32 to vector<8x512xf32>
    %278 = arith.maximumf %276, %277 : vector<8x512xf32>
    %c0_102 = arith.constant 0 : index
    %c0_103 = arith.constant 0 : index
    %279 = arith.index_cast %248 : i32 to index
    %280 = vector.load %arg6[%c0_102, %c0_103, %279] : memref<1x8x4096xf32, #tpu.memory_space<vmem>>, vector<1x8x512xf32>
    %281 = vector.shape_cast %280 : vector<1x8x512xf32> to vector<8x512xf32>
    %282 = vector.shape_cast %278 : vector<8x512xf32> to vector<1x8x512xf32>
    tpu.vector_store %arg6[%c0_102, %c0_103, %279], %282 {strides = array<i32>} : memref<1x8x4096xf32, #tpu.memory_space<vmem>>, vector<1x8x512xf32>,
    %c0_104 = arith.constant 0 : index
    %c0_105 = arith.constant 0 : index
    %283 = arith.index_cast %248 : i32 to index
    %284 = vector.load %arg7[%c0_104, %c0_105, %283] : memref<1x2x4096xf32, #tpu.memory_space<vmem>>, vector<1x2x512xf32>
    %285 = vector.shape_cast %284 : vector<1x2x512xf32> to vector<2x512xf32>
    %286 = vector.shape_cast %266 : vector<2x512xf32> to vector<1x2x512xf32>
    tpu.vector_store %arg7[%c0_104, %c0_105, %283], %286 {strides = array<i32>} : memref<1x2x4096xf32, #tpu.memory_space<vmem>>, vector<1x2x512xf32>,
    %c7_i32 = arith.constant 7 : i32
    %c512_i32_106 = arith.constant 512 : i32
    %287 = arith.muli %c7_i32, %c512_i32_106 : i32
    %288 = tpu.assume_multiple %287, 512 : i32
    %c0_107 = arith.constant 0 : index
    %c0_108 = arith.constant 0 : index
    %289 = arith.index_cast %288 : i32 to index
    %290 = vector.load %arg2[%c0_107, %c0_108, %289] : memref<1x8x4096xf32, #tpu.memory_space<vmem>>, vector<1x8x512xf32>
    %291 = vector.shape_cast %290 : vector<1x8x512xf32> to vector<8x512xf32>
    %c0_109 = arith.constant 0 : index
    %c0_110 = arith.constant 0 : index
    %292 = arith.index_cast %288 : i32 to index
    %293 = vector.load %arg3[%c0_109, %c0_110, %292] : memref<1x8x4096xf32, #tpu.memory_space<vmem>>, vector<1x8x512xf32>
    %294 = vector.shape_cast %293 : vector<1x8x512xf32> to vector<8x512xf32>
    %cst_111 = arith.constant dense<0.000000e+00> : vector<8x512xf32>
    %295 = tpu.matmul %1, %291, %cst_111 {dimension_numbers = #tpu.dot_dimension_numbers<[1], [0], [0], [1], [0, 0, 1, 1], [], []>} : vector<8x8xf32>, vector<8x512xf32>, vector<8x512xf32> -> vector<8x512xf32>
    %296 = arith.addf %295, %294 : vector<8x512xf32>
    %cst_112 = arith.constant 0.000000e+00 : f32
    %297 = vector.broadcast %cst_112 : f32 to vector<8x512xf32>
    %298 = arith.maximumf %296, %297 : vector<8x512xf32>
    %cst_113 = arith.constant dense<0.000000e+00> : vector<2x512xf32>
    %299 = tpu.matmul %2, %298, %cst_113 {dimension_numbers = #tpu.dot_dimension_numbers<[1], [0], [0], [1], [0, 0, 1, 1], [], []>} : vector<2x8xf32>, vector<8x512xf32>, vector<2x512xf32> -> vector<2x512xf32>
    %300 = vector.broadcast %5 : vector<2x1xf32> to vector<2x512xf32>
    %301 = arith.addf %299, %300 : vector<2x512xf32>
    %302 = arith.negf %301 : vector<2x512xf32>
    %303 = math.exp %302 : vector<2x512xf32>
    %cst_114 = arith.constant 1.000000e+00 : f32
    %304 = vector.broadcast %cst_114 : f32 to vector<2x512xf32>
    %305 = arith.addf %304, %303 : vector<2x512xf32>
    %306 = arith.divf %304, %305 : vector<2x512xf32>
    %307 = vector.extract_strided_slice %306 {offsets = [0, 0], sizes = [1, 512], strides = [1, 1]} : vector<2x512xf32> to vector<1x512xf32>
    %308 = vector.broadcast %307 : vector<1x512xf32> to vector<8x512xf32>
    %309 = arith.mulf %308, %291 : vector<8x512xf32>
    %310 = vector.extract_strided_slice %306 {offsets = [1, 0], sizes = [1, 512], strides = [1, 1]} : vector<2x512xf32> to vector<1x512xf32>
    %311 = vector.broadcast %310 : vector<1x512xf32> to vector<8x512xf32>
    %312 = arith.mulf %311, %291 : vector<8x512xf32>
    %313 = tpu.concatenate %309, %312 in 0 : vector<8x512xf32>, vector<8x512xf32> -> vector<16x512xf32>
    %cst_115 = arith.constant dense<0.000000e+00> : vector<8x512xf32>
    %314 = tpu.matmul %3, %313, %cst_115 {dimension_numbers = #tpu.dot_dimension_numbers<[1], [0], [0], [1], [0, 0, 1, 1], [], []>} : vector<8x16xf32>, vector<16x512xf32>, vector<8x512xf32> -> vector<8x512xf32>
    %315 = vector.broadcast %6 : vector<8x1xf32> to vector<8x512xf32>
    %316 = arith.addf %314, %315 : vector<8x512xf32>
    %cst_116 = arith.constant 0.000000e+00 : f32
    %317 = vector.broadcast %cst_116 : f32 to vector<8x512xf32>
    %318 = arith.maximumf %316, %317 : vector<8x512xf32>
    %c0_117 = arith.constant 0 : index
    %c0_118 = arith.constant 0 : index
    %319 = arith.index_cast %288 : i32 to index
    %320 = vector.load %arg6[%c0_117, %c0_118, %319] : memref<1x8x4096xf32, #tpu.memory_space<vmem>>, vector<1x8x512xf32>
    %321 = vector.shape_cast %320 : vector<1x8x512xf32> to vector<8x512xf32>
    %322 = vector.shape_cast %318 : vector<8x512xf32> to vector<1x8x512xf32>
    tpu.vector_store %arg6[%c0_117, %c0_118, %319], %322 {strides = array<i32>} : memref<1x8x4096xf32, #tpu.memory_space<vmem>>, vector<1x8x512xf32>,
    %c0_119 = arith.constant 0 : index
    %c0_120 = arith.constant 0 : index
    %323 = arith.index_cast %288 : i32 to index
    %324 = vector.load %arg7[%c0_119, %c0_120, %323] : memref<1x2x4096xf32, #tpu.memory_space<vmem>>, vector<1x2x512xf32>
    %325 = vector.shape_cast %324 : vector<1x2x512xf32> to vector<2x512xf32>
    %326 = vector.shape_cast %306 : vector<2x512xf32> to vector<1x2x512xf32>
    tpu.vector_store %arg7[%c0_119, %c0_120, %323], %326 {strides = array<i32>} : memref<1x2x4096xf32, #tpu.memory_space<vmem>>, vector<1x2x512xf32>,
    %c8_i32 = arith.constant 8 : i32
    return
  }
  func.func @transform_0(%arg0: i32, %arg1: i32) -> (i32, i32, i32) {
    %c0_i32 = arith.constant 0 : i32
    %c0_i32_0 = arith.constant 0 : i32
    return %arg0, %c0_i32, %arg1 : i32, i32, i32
  }
  func.func @transform_1(%arg0: i32, %arg1: i32) -> (i32, i32, i32) {
    %c0_i32 = arith.constant 0 : i32
    %c0_i32_0 = arith.constant 0 : i32
    return %arg0, %c0_i32, %arg1 : i32, i32, i32
  }
  func.func @transform_2(%arg0: i32, %arg1: i32) -> (i32, i32) {
    %c0_i32 = arith.constant 0 : i32
    %c0_i32_0 = arith.constant 0 : i32
    %c0_i32_1 = arith.constant 0 : i32
    return %c0_i32, %c0_i32_0 : i32, i32
  }
  func.func @transform_3(%arg0: i32, %arg1: i32) -> (i32, i32) {
    %c0_i32 = arith.constant 0 : i32
    %c0_i32_0 = arith.constant 0 : i32
    %c0_i32_1 = arith.constant 0 : i32
    return %c0_i32, %c0_i32_0 : i32, i32
  }
  func.func @transform_4(%arg0: i32, %arg1: i32) -> (i32, i32, i32) {
    %c0_i32 = arith.constant 0 : i32
    %c0_i32_0 = arith.constant 0 : i32
    return %arg0, %c0_i32, %arg1 : i32, i32, i32
  }
  func.func @transform_5(%arg0: i32, %arg1: i32) -> (i32, i32, i32) {
    %c0_i32 = arith.constant 0 : i32
    %c0_i32_0 = arith.constant 0 : i32
    return %arg0, %c0_i32, %arg1 : i32, i32, i32
  }
}

</mosaic_0001>

<bundles_post_ra>
// kernel: multi_attention_block.1
= control target key start
LH: loop header
LB: loop body
LE: loop exit
PB: predicated region body
PF: predicated region fallthrough
CT: control target
= control target key end

     0   :  { %s5273_s18 = smov 0   ;;  %s5275_s19 = smov 0   ;;  %s5926_s0 = inlined_call_operand.vmem [shape: f32[2,8,4096], index: 0, kind: input, shape index: {}]   ;;  %s5927_s1 = inlined_call_operand.vmem [shape: f32[2,8,4096], index: 1, kind: input, shape index: {}]   ;;  %s5928_s2 = inlined_call_operand.vmem [shape: f32[18,16], index: 2, kind: input, shape index: {}]   ;;  %s5929_s3 = inlined_call_operand.vmem [shape: f32[10,1], index: 3, kind: input, shape index: {}]   ;;  %s5930_s4 = inlined_call_operand.vmem [shape: f32[2,8,4096], index: 4, kind: output, shape index: {0}]   ;;  %s5931_s5 = inlined_call_operand.vmem [shape: f32[2,2,4096], index: 5, kind: output, shape index: {1}]  }
   0x1   :  { %s5277_s20 = smov 0  }
   0x2 LB: > { %s28_s21 = sadd.s32 1, %s5234_s19  ;;  %p4808_p0 = scmp.ge.s32.totalorder %s5238_s20, 1  ;;  %s5238_s20 = sphi %s5277_s20, %s16_s20   ;;  %s5234_s19 = sphi %s5275_s19, %s5933_s19   ;;  %s5230_s18 = sphi %s5273_s18, %s5932_s18  }
   0x3   : > { %p30_p1 = scmp.ge.s32.totalorder %s28_s21, 2  ;;  %p230_p2 = scmp.lt.s32.totalorder %s5238_s20, 3 }
   0x5   : > { %s5935_s21 = smov (%p30_p1, %s28_s21), 0  ;;  %p231_p3 = pnand %p4808_p0, %p230_p2 }
   0x6   : > { %p285_p4 = scmp.lt.s32.totalorder (!%p231_p3), %s5230_s18, 1  ;;  %v5240_v0 = vmov (!%p231_p3), 0.0   ;;  %v5307_v1 = vld [vmem:[%s5928_s2] sm:$0xff] (!%p231_p3)  ;;  %vm337_vm0 = vcmask (!%p231_p3), 64512   ;;  %v5241_v7 = vmov (!%p231_p3), 0   ;;  %v5350_v25 = vld [vmem:[%s5928_s2 + $0x8] sm:$0xff] (!%p231_p3)  ;;  %v661_v44 = vlaneseq (!%p231_p3) }
   0x7   : > { %234 = sbr.rel (%p231_p3) target bundleno = 4035 (0xfc3), region = 36  ;;  %405 = vmatprep.mubr.f32.mxu0 (!%p231_p3), %v5240_v0  ;;  %476 = vmatprep.mubr.f32.mxu1 (!%p231_p3), %v5240_v0  ;;  %v327_v6 = vld [vmem:[%s5929_s3] sm:$0xff] (!%p231_p3)  ;;  %v328_v8 = vld [vmem:[%s5929_s3 + $0x8] sm:$0x3] (!%p231_p3)  ;;  %v5242_v49 = vmov (!%p231_p3), 1983009808  }
   0x8   : > { %5085 = vset.pattern.permute.xlu0 (!%p231_p3), %v5241_v7  ;;  %v662_v48 = vshrl.u32 (!%p231_p3), %v661_v44, 7  ;;  %v874_v50 = vunpack.c.l.s4 (!%p231_p3), %v5242_v49  ;;  %v707_v62 = vrot.slane (!%p231_p3), %v5350_v25, 2  ;;  %vm706_vm1 = vcmask (!%p231_p3), 1045504  }
   0x9   : > { %489 = vperm.xlu0 (!%p231_p3), %5085, %v327_v6   ;;  %vm714_vm2 = vcmask (!%p231_p3), 130048  }
   0xa   : > { %v5364_v51 = vsub.s32 (!%p231_p3), 0, %v662_v48  ;;  %v5366_v52 = vsub.s32 (!%p231_p3), 1, %v662_v48  ;;  %v875_v53 = vunpack.c.0.s8 (!%p231_p3), %v874_v50 }
   0xc   : > { %v5368_v56 = vsub.s32 (!%p231_p3), %v875_v53, %v662_v48 }
   0xd   : > { %703 = vperm.xlu0 (!%p231_p3), %5085, %v328_v8  }
   0xe   : > { %s5937_s18 = smov (!%p285_p4, %s5230_s18), 1 }
   0xf   : > { %s5296_s22 = sshll.u32 %s5937_s18, 8  ;;  %s4993_s14 = sshll.u32 %s5937_s18, 6 }
  0x10   : > { %s5302_s25 = scalar_lea.vmem %s5926_s0, %s5296_s22  ;;  %s5341_s9 = scalar_lea.vmem %s5927_s1, %s5296_s22 }
  0x11   : > { %v5310_v2 = vld [vmem:[%s5302_s25 + $0x8] sm:$0xff]  ;;  %v5313_v3 = vld [vmem:[%s5302_s25 + $0x18] sm:$0xff]  ;;  %v5316_v4 = vld [vmem:[%s5302_s25] sm:$0xff]  ;;  %s5395_s17 = scalar_lea.vmem %s5931_s5, %s4993_s14  ;;  %s5439_s24 = scalar_lea.vmem %s5930_s4, %s5296_s22 }
  0x12   : > { %341 = vmatprep.subr.mxu0 %v5310_v2  ;;  %412 = vmatprep.subr.mxu1 %v5313_v3  ;;  %v5321_v5 = vld [vmem:[%s5302_s25 + $0x10] sm:$0xff]  ;;  %v333_v9 = vld [vmem:[%s5341_s9] sm:$0xff]  ;;  %v334_v11 = vld [vmem:[%s5341_s9 + $0x8] sm:$0xff] }
  0x13   : > { %342 = vmatpush1.msra.mxu0 %v5316_v4  ;;  %413 = vmatpush1.msra.mxu1 %v5321_v5  ;;  %v335_v10 = vld [vmem:[%s5341_s9 + $0x10] sm:$0xff]  ;;  %v336_v12 = vld [vmem:[%s5341_s9 + $0x18] sm:$0xff] }
  0x14   : > { %4817 = vmatmul.mubr.msk.f32.vlgmr.msra.gmra.mrb[0].mxu0 %vm337_vm0, %v5307_v1  ;;  %4818 = vmatmul.mubr.msk.f32.vlgmr.msra.gmra.mrb[0].mxu1 %vm337_vm0, %v5307_v1  ;;  %v4834_v53 = vld [vmem:[%s5341_s9 + $0x38] sm:$0xff] }
  0x15   : > { %559 = vmatprep.mubr.f32.mxu0 %v5240_v0  ;;  %630 = vmatprep.mubr.f32.mxu1 %v5240_v0 }
  0x88   : > { %v5358_v26 = vpop.permute.xlu0 %489 }
  0xe7   : > { %v407_v13 = vpop.f32.mrb[0].mxu0  ;;  %v478_v14 = vpop.f32.mrb[0].mxu1 }
  0xe8   : > { %v408_v15 = vadd.f32 %v407_v13, %v333_v9  ;;  %v479_v16 = vadd.f32 %v478_v14, %v335_v10  ;;  %v409_v17 = vpop.f32.mrb[1].mxu0  ;;  %v480_v18 = vpop.f32.mrb[1].mxu1  ;;  %v326_v10 = vld [vmem:[%s5928_s2 + $0x10] sm:$0x3] }
  0xe9   : > { %v410_v19 = vadd.f32 %v409_v17, %v334_v11  ;;  %v481_v20 = vadd.f32 %v480_v18, %v336_v12 }
  0xea   : > { %v483_v23 = vmax.f32 %v408_v15, 0.0  ;;  %v485_v24 = vmax.f32 %v479_v16, 0.0 }
  0xeb   : > { %v484_v21 = vmax.f32 %v410_v19, 0.0  ;;  %v486_v22 = vmax.f32 %v481_v20, 0.0 }
  0xed   : > { %495 = vmatprep.subr.mxu0 %v484_v21  ;;  %566 = vmatprep.subr.mxu1 %v486_v22  ;;  %v708_v22 = vrot.slane %v326_v10, 2 }
  0xee   : > { %496 = vmatpush1.msra.mxu0 %v483_v23  ;;  %567 = vmatpush1.msra.mxu1 %v485_v24 }
  0xef   : > { %4819 = vmatmul.mubr.msk.f32.vlgmr.msra.gmra.mrb[2].mxu0 %vm337_vm0, %v5350_v25  ;;  %4820 = vmatmul.mubr.msk.f32.vlgmr.msra.gmra.mrb[2].mxu1 %vm337_vm0, %v5350_v25 }
  0xf0   : > { %781 = vmatprep.mubr.f32.mxu0 %v5240_v0  ;;  %852 = vmatprep.mubr.f32.mxu1 %v5240_v0 }
 0x1c2   : > { %v561_v27 = vpop.f32.mrb[2].mxu0  ;;  %v632_v28 = vpop.f32.mrb[2].mxu1 }
 0x1c3   : > { %v562_v29 = vadd.f32 %v561_v27, %v5358_v26  ;;  %v633_v30 = vadd.f32 %v632_v28, %v5358_v26  ;;  %v563_v31 = vpop.f32.mrb[3].mxu0  ;;  %v634_v32 = vpop.f32.mrb[3].mxu1  ;;  %v5399_v28 = vld [vmem:[%s5302_s25 + $0x28] sm:$0xff] }
 0x1c4   : > { %v564_v33 = vadd.f32 %v563_v31, %v5358_v26  ;;  %v635_v34 = vadd.f32 %v634_v32, %v5358_v26  ;;  %v5414_v31 = vld [vmem:[%s5302_s25 + $0x30] sm:$0xff]  ;;  %v704_v32 = vpop.permute.xlu0 %703 }
 0x1c5   : > { %v4821_v35 = vmul.f32 -1.442695, %v562_v29  ;;  %v4823_v36 = vmul.f32 -1.442695, %v633_v30  ;;  %v5402_v29 = vld [vmem:[%s5302_s25 + $0x38] sm:$0xff]  ;;  %v5406_v30 = vsel %vm706_vm1, %v707_v62, %v708_v22 }
 0x1c6   : > { %v4822_v37 = vmul.f32 -1.442695, %v564_v33  ;;  %v4824_v38 = vmul.f32 -1.442695, %v635_v34  ;;  %v710_v33 = vrot.slane %v5358_v26, 2  ;;  %v711_v34 = vrot.slane %v704_v32, 2 }
 0x1c7   : > { %5086 = vpow2.f32 %v4821_v35 }
 0x1c8   : > { %5088 = vpow2.f32 %v4823_v36  ;;  %v5432_v35 = vsel %vm706_vm1, %v710_v33, %v711_v34 }
 0x1c9   : > { %5090 = vpow2.f32 %v4822_v37 }
 0x1ca   : > { %5092 = vpow2.f32 %v4824_v38 }
 0x1d1   : > { %v5087_v39 = vpop.eup %5086 }
 0x1d2   : > { %v5089_v40 = vpop.eup %5088  ;;  %v649_v41 = vadd.f32 1.0, %v5087_v39 }
 0x1d3   : > { %v5091_v42 = vpop.eup %5090  ;;  %v651_v43 = vadd.f32 1.0, %v5089_v40 }
 0x1d4   : > { %v5093_v45 = vpop.eup %5092  ;;  %5094 = vrcp.f32 %v649_v41  ;;  %v650_v46 = vadd.f32 1.0, %v5091_v42 }
 0x1d5   : > { %5096 = vrcp.f32 %v651_v43  ;;  %v652_v47 = vadd.f32 1.0, %v5093_v45  ;;  %v4831_v43 = vld [vmem:[%s5341_s9 + $0x20] sm:$0xff] }
 0x1d6   : > { %5098 = vrcp.f32 %v650_v46  ;;  %v4833_v46 = vld [vmem:[%s5341_s9 + $0x30] sm:$0xff] }
 0x1d7   : > { %5100 = vrcp.f32 %v652_v47  ;;  %v4832_v47 = vld [vmem:[%s5341_s9 + $0x28] sm:$0xff] }
 0x1de   : > { %v5095_v54 = vpop.eup %5094 }
 0x1df   : > { %v5097_v55 = vpop.eup %5096  ;;  %v664_v57 = vrot.slane %v5095_v54, %v5364_v51  ;;  %v684_v58 = vrot.slane %v5095_v54, %v5366_v52 }
 0x1e0   : > { %v5099_v59 = vpop.eup %5098  ;;  %v672_v60 = vrot.slane %v5097_v55, %v5364_v51  ;;  %v692_v61 = vrot.slane %v5097_v55, %v5366_v52 }
 0x1e1   : > { %v5101_v63 = vpop.eup %5100  ;;  %v871_v6 = vcombine.low %v5095_v54, %v5099_v59  ;;  %v668_v7 = vrot.slane %v5099_v59, %v5364_v51  ;;  %v688_v8 = vrot.slane %v5099_v59, %v5366_v52  ;;  %v677_v9 = vmul.f32 %v664_v57, %v5316_v4 }
 0x1e2   : > { %v872_v11 = vcombine.low %v5097_v55, %v5101_v63  ;;  %v676_v12 = vrot.slane %v5101_v63, %v5364_v51  ;;  %v696_v13 = vrot.slane %v5101_v63, %v5366_v52  ;;  %v697_v14 = vmul.f32 %v684_v58, %v5316_v4 }
 0x1e3   : > { %v879_v15 = vrot.slane %v871_v6, %v5368_v56  ;;  %v678_v16 = vmul.f32 %v668_v7, %v5310_v2  ;;  %v698_v17 = vmul.f32 %v688_v8, %v5310_v2  ;;  %v679_v18 = vmul.f32 %v672_v60, %v5321_v5 }
 0x1e4   : > { %v886_v19 = vrot.slane %v872_v11, %v5368_v56  ;;  %v680_v20 = vmul.f32 %v676_v12, %v5313_v3  ;;  %v700_v21 = vmul.f32 %v696_v13, %v5313_v3  ;;  %v699_v23 = vmul.f32 %v692_v61, %v5321_v5  ;;  %v5410_v5 = vld [vmem:[%s5302_s25 + $0x20] sm:$0xff] }
 0x1e5   : > { %v4994_v4 = vpack.c.bf16 %v698_v17, %v678_v16  ;;  %v4996_v27 = vpack.c.bf16 %v697_v14, %v677_v9 }
 0x1e6   : > { %v887_v2 = vcombine.low %v879_v15, %v886_v19  ;;  %v4998_v24 = vpack.c.bf16 %v700_v21, %v680_v20  ;;  %v5000_v3 = vpack.c.bf16 %v699_v23, %v679_v18 }
 0x1e7   : > { %4995 = vmatprep.subr.bf16.mxu0 %v4994_v4 }
 0x1e8   : > { %889 = vst [vmem:[%s5395_s17] sm:$0xff] %v887_v2  ;;  %4999 = vmatprep.subr.bf16.mxu1 %v4998_v24  ;;  %4997 = vmatpush1.bf16.msra.mxu0 %v4996_v27 }
 0x1e9   : > { %5001 = vmatpush1.bf16.msra.mxu1 %v5000_v3  ;;  %900 = vmatprep.subr.mxu0 %v5399_v28 }
 0x1ea   : > { %971 = vmatprep.subr.mxu1 %v5402_v29 }
 0x1eb   : > { %4825 = vmatmul.mubr.msk.f32.vlgmr.msra.gmra.mrb[4].mxu0 %vm714_vm2, %v5406_v30 }
 0x1ec   : > { %4826 = vmatmul.mubr.msk.f32.vlgmr.msra.gmra.mrb[4].mxu1 %vm714_vm2, %v5406_v30  ;;  %901 = vmatpush1.msra.mxu0 %v5410_v5 }
 0x1ed   : > { %964 = vmatprep.mubr.f32.mxu0 %v5240_v0  ;;  %972 = vmatpush1.msra.mxu1 %v5414_v31 }
 0x1ee   : > { %1035 = vmatprep.mubr.f32.mxu1 %v5240_v0 }
 0x1ef   : > { %4835 = vmatmul.mubr.msk.f32.vlgmr.msra.gmra.mrb[6].mxu0 %vm337_vm0, %v5307_v1 }
 0x1f0   : > { %4836 = vmatmul.mubr.msk.f32.vlgmr.msra.gmra.mrb[6].mxu1 %vm337_vm0, %v5307_v1  ;;  %1110 = vmatprep.mubr.f32.mxu0 %v5240_v0 }
 0x1f1   : > { %1181 = vmatprep.mubr.f32.mxu1 %v5240_v0 }
 0x2be   : > { %v783_v36 = vpop.f32.mrb[4].mxu0 }
 0x2bf   : > { %v784_v37 = vadd.f32 %v783_v36, %v5432_v35  ;;  %v854_v38 = vpop.f32.mrb[4].mxu1  ;;  %v785_v39 = vpop.f32.mrb[5].mxu0 }
 0x2c0   : > { %v855_v40 = vadd.f32 %v854_v38, %v5432_v35  ;;  %v786_v41 = vadd.f32 %v785_v39, %v5432_v35  ;;  %v856_v42 = vpop.f32.mrb[5].mxu1 }
 0x2c1   : > { %v859_v44 = vmax.f32 %v784_v37, 0.0  ;;  %v857_v45 = vadd.f32 %v856_v42, %v5432_v35 }
 0x2c2   : > { %v861_v48 = vmax.f32 %v855_v40, 0.0  ;;  %v860_v49 = vmax.f32 %v786_v41, 0.0  ;;  %v966_v50 = vpop.f32.mrb[6].mxu0 }
 0x2c3   : > { %863 = vst [vmem:[%s5439_s24] sm:$0xff] %v859_v44  ;;  %v862_v54 = vmax.f32 %v857_v45, 0.0  ;;  %v967_v55 = vadd.f32 %v4831_v43, %v966_v50  ;;  %v1037_v57 = vpop.f32.mrb[6].mxu1  ;;  %v968_v58 = vpop.f32.mrb[7].mxu0 }
 0x2c4   : > { %865 = vst [vmem:[%s5439_s24 + $0x10] sm:$0xff] %v861_v48  ;;  %864 = vst [vmem:[%s5439_s24 + $0x8] sm:$0xff] %v860_v49  ;;  %v1038_v59 = vadd.f32 %v4833_v46, %v1037_v57  ;;  %v969_v60 = vadd.f32 %v4832_v47, %v968_v58  ;;  %v1039_v61 = vpop.f32.mrb[7].mxu1 }
 0x2c5   : > { %866 = vst [vmem:[%s5439_s24 + $0x18] sm:$0xff] %v862_v54  ;;  %v1040_v62 = vadd.f32 %v4834_v53, %v1039_v61  ;;  %v1042_v6 = vmax.f32 %v967_v55, 0.0 }
 0x2c6   : > { %v1043_v63 = vmax.f32 %v969_v60, 0.0  ;;  %v1044_v8 = vmax.f32 %v1038_v59, 0.0 }
 0x2c7   : > { %v1045_v7 = vmax.f32 %v1040_v62, 0.0 }
 0x2c8   : > { %1046 = vmatprep.subr.mxu0 %v1043_v63  ;;  %v5481_v63 = vld [vmem:[%s5302_s25 + $0x48] sm:$0xff] }
 0x2c9   : > { %1117 = vmatprep.subr.mxu1 %v1045_v7  ;;  %1047 = vmatpush1.msra.mxu0 %v1042_v6  ;;  %v5484_v6 = vld [vmem:[%s5302_s25 + $0x58] sm:$0xff] }
 0x2ca   : > { %1118 = vmatpush1.msra.mxu1 %v1044_v8  ;;  %4837 = vmatmul.mubr.msk.f32.vlgmr.msra.gmra.mrb[8].mxu0 %vm337_vm0, %v5350_v25 }
 0x2cb   : > { %4838 = vmatmul.mubr.msk.f32.vlgmr.msra.gmra.mrb[8].mxu1 %vm337_vm0, %v5350_v25  ;;  %1316 = vmatprep.mubr.f32.mxu0 %v5240_v0 }
 0x2cc   : > { %1387 = vmatprep.mubr.f32.mxu1 %v5240_v0 }
 0x39d   : > { %v1112_v9 = vpop.f32.mrb[8].mxu0 }
 0x39e   : > { %v1113_v10 = vadd.f32 %v1112_v9, %v5358_v26  ;;  %v1183_v11 = vpop.f32.mrb[8].mxu1  ;;  %v1114_v12 = vpop.f32.mrb[9].mxu0 }
 0x39f   : > { %v1184_v13 = vadd.f32 %v1183_v11, %v5358_v26  ;;  %v1115_v14 = vadd.f32 %v1114_v12, %v5358_v26  ;;  %v1185_v15 = vpop.f32.mrb[9].mxu1 }
 0x3a0   : > { %v4839_v16 = vmul.f32 -1.442695, %v1113_v10  ;;  %v1186_v17 = vadd.f32 %v1185_v15, %v5358_v26 }
 0x3a1   : > { %v4841_v18 = vmul.f32 -1.442695, %v1184_v13  ;;  %v4840_v19 = vmul.f32 -1.442695, %v1115_v14  ;;  %v4854_v14 = vld [vmem:[%s5341_s9 + $0x40] sm:$0xff] }
 0x3a2   : > { %5102 = vpow2.f32 %v4839_v16  ;;  %v4842_v20 = vmul.f32 -1.442695, %v1186_v17  ;;  %v4856_v17 = vld [vmem:[%s5341_s9 + $0x50] sm:$0xff] }
 0x3a3   : > { %5104 = vpow2.f32 %v4841_v18  ;;  %v4855_v18 = vld [vmem:[%s5341_s9 + $0x48] sm:$0xff] }
 0x3a4   : > { %5106 = vpow2.f32 %v4840_v19 }
 0x3a5   : > { %5108 = vpow2.f32 %v4842_v20 }
 0x3ac   : > { %v5103_v21 = vpop.eup %5102 }
 0x3ad   : > { %v5105_v22 = vpop.eup %5104  ;;  %v1200_v4 = vadd.f32 1.0, %v5103_v21 }
 0x3ae   : > { %v5107_v23 = vpop.eup %5106  ;;  %v1202_v2 = vadd.f32 1.0, %v5105_v22  ;;  %v4857_v22 = vld [vmem:[%s5341_s9 + $0x58] sm:$0xff] }
 0x3af   : > { %v5109_v24 = vpop.eup %5108  ;;  %5110 = vrcp.f32 %v1200_v4  ;;  %v1201_v27 = vadd.f32 1.0, %v5107_v23 }
 0x3b0   : > { %5112 = vrcp.f32 %v1202_v2  ;;  %v1203_v3 = vadd.f32 1.0, %v5109_v24 }
 0x3b1   : > { %5114 = vrcp.f32 %v1201_v27 }
 0x3b2   : > { %5116 = vrcp.f32 %v1203_v3 }
 0x3b9   : > { %v5111_v32 = vpop.eup %5110 }
 0x3ba   : > { %v5113_v33 = vpop.eup %5112  ;;  %v1215_v34 = vrot.slane %v5111_v32, %v5364_v51  ;;  %v1235_v36 = vrot.slane %v5111_v32, %v5366_v52 }
 0x3bb   : > { %v5115_v37 = vpop.eup %5114  ;;  %v1223_v38 = vrot.slane %v5113_v33, %v5364_v51  ;;  %v1243_v39 = vrot.slane %v5113_v33, %v5366_v52 }
 0x3bc   : > { %v5117_v40 = vpop.eup %5116  ;;  %v1407_v41 = vcombine.low %v5111_v32, %v5115_v37  ;;  %v1219_v42 = vrot.slane %v5115_v37, %v5364_v51  ;;  %v1239_v43 = vrot.slane %v5115_v37, %v5366_v52  ;;  %v1228_v44 = vmul.f32 %v5410_v5, %v1215_v34 }
 0x3bd   : > { %v1408_v45 = vcombine.low %v5113_v33, %v5117_v40  ;;  %v1227_v46 = vrot.slane %v5117_v40, %v5364_v51  ;;  %v1247_v47 = vrot.slane %v5117_v40, %v5366_v52  ;;  %v1248_v48 = vmul.f32 %v5410_v5, %v1235_v36 }
 0x3be   : > { %v1415_v49 = vrot.slane %v1407_v41, %v5368_v56  ;;  %v1229_v50 = vmul.f32 %v5399_v28, %v1219_v42  ;;  %v1249_v53 = vmul.f32 %v5399_v28, %v1239_v43  ;;  %v1230_v54 = vmul.f32 %v5414_v31, %v1223_v38 }
 0x3bf   : > { %v1422_v55 = vrot.slane %v1408_v45, %v5368_v56  ;;  %v1231_v57 = vmul.f32 %v5402_v29, %v1227_v46  ;;  %v1251_v58 = vmul.f32 %v5402_v29, %v1247_v47  ;;  %v1250_v5 = vmul.f32 %v5414_v31, %v1243_v39  ;;  %v5489_v29 = vld [vmem:[%s5302_s25 + $0x40] sm:$0xff]  ;;  %v5493_v31 = vld [vmem:[%s5302_s25 + $0x50] sm:$0xff] }
 0x3c0   : > { %v5002_v59 = vpack.c.bf16 %v1249_v53, %v1229_v50  ;;  %v5004_v62 = vpack.c.bf16 %v1248_v48, %v1228_v44 }
 0x3c1   : > { %v1423_v60 = vcombine.low %v1415_v49, %v1422_v55  ;;  %v5006_v61 = vpack.c.bf16 %v1251_v58, %v1231_v57  ;;  %v5008_v28 = vpack.c.bf16 %v1250_v5, %v1230_v54 }
 0x3c2   : > { %5003 = vmatprep.subr.bf16.mxu0 %v5002_v59 }
 0x3c3   : > { %4849 = vst [vmem:[%s5395_s17 + $0x8] sm:$0xff] %v1423_v60  ;;  %5007 = vmatprep.subr.bf16.mxu1 %v5006_v61  ;;  %5005 = vmatpush1.bf16.msra.mxu0 %v5004_v62 }
 0x3c4   : > { %5009 = vmatpush1.bf16.msra.mxu1 %v5008_v28  ;;  %1437 = vmatprep.subr.mxu0 %v5481_v63 }
 0x3c5   : > { %1508 = vmatprep.subr.mxu1 %v5484_v6 }
 0x3c6   : > { %4843 = vmatmul.mubr.msk.f32.vlgmr.msra.gmra.mrb[10].mxu0 %vm714_vm2, %v5406_v30 }
 0x3c7   : > { %4844 = vmatmul.mubr.msk.f32.vlgmr.msra.gmra.mrb[10].mxu1 %vm714_vm2, %v5406_v30  ;;  %1438 = vmatpush1.msra.mxu0 %v5489_v29 }
 0x3c8   : > { %1501 = vmatprep.mubr.f32.mxu0 %v5240_v0  ;;  %1509 = vmatpush1.msra.mxu1 %v5493_v31 }
 0x3c9   : > { %1572 = vmatprep.mubr.f32.mxu1 %v5240_v0 }
 0x3ca   : > { %4858 = vmatmul.mubr.msk.f32.vlgmr.msra.gmra.mrb[12].mxu0 %vm337_vm0, %v5307_v1 }
 0x3cb   : > { %4859 = vmatmul.mubr.msk.f32.vlgmr.msra.gmra.mrb[12].mxu1 %vm337_vm0, %v5307_v1  ;;  %1647 = vmatprep.mubr.f32.mxu0 %v5240_v0 }
 0x3cc   : > { %1718 = vmatprep.mubr.f32.mxu1 %v5240_v0 }
 0x499   : > { %v1318_v7 = vpop.f32.mrb[10].mxu0 }
 0x49a   : > { %v1319_v8 = vadd.f32 %v1318_v7, %v5432_v35  ;;  %v1389_v9 = vpop.f32.mrb[10].mxu1  ;;  %v1320_v10 = vpop.f32.mrb[11].mxu0 }
 0x49b   : > { %v1390_v11 = vadd.f32 %v1389_v9, %v5432_v35  ;;  %v1321_v12 = vadd.f32 %v1320_v10, %v5432_v35  ;;  %v1391_v13 = vpop.f32.mrb[11].mxu1 }
 0x49c   : > { %v1394_v15 = vmax.f32 %v1319_v8, 0.0  ;;  %v1392_v16 = vadd.f32 %v1391_v13, %v5432_v35 }
 0x49d   : > { %v1396_v19 = vmax.f32 %v1390_v11, 0.0  ;;  %v1395_v20 = vmax.f32 %v1321_v12, 0.0  ;;  %v1503_v21 = vpop.f32.mrb[12].mxu0 }
 0x49e   : > { %4845 = vst [vmem:[%s5439_s24 + $0x20] sm:$0xff] %v1394_v15  ;;  %v1397_v4 = vmax.f32 %v1392_v16, 0.0  ;;  %v1504_v23 = vadd.f32 %v4854_v14, %v1503_v21  ;;  %v1574_v2 = vpop.f32.mrb[12].mxu1  ;;  %v1505_v24 = vpop.f32.mrb[13].mxu0 }
 0x49f   : > { %4847 = vst [vmem:[%s5439_s24 + $0x30] sm:$0xff] %v1396_v19  ;;  %4846 = vst [vmem:[%s5439_s24 + $0x28] sm:$0xff] %v1395_v20  ;;  %v1575_v27 = vadd.f32 %v4856_v17, %v1574_v2  ;;  %v1506_v3 = vadd.f32 %v4855_v18, %v1505_v24  ;;  %v1576_v32 = vpop.f32.mrb[13].mxu1 }
 0x4a0   : > { %4848 = vst [vmem:[%s5439_s24 + $0x38] sm:$0xff] %v1397_v4  ;;  %v1577_v33 = vadd.f32 %v4857_v22, %v1576_v32  ;;  %v1579_v36 = vmax.f32 %v1504_v23, 0.0 }
 0x4a1   : > { %v1580_v34 = vmax.f32 %v1506_v3, 0.0  ;;  %v1581_v38 = vmax.f32 %v1575_v27, 0.0 }
 0x4a2   : > { %v1582_v37 = vmax.f32 %v1577_v33, 0.0 }
 0x4a3   : > { %1583 = vmatprep.subr.mxu0 %v1580_v34  ;;  %v5550_v34 = vld [vmem:[%s5302_s25 + $0x68] sm:$0xff] }
 0x4a4   : > { %1654 = vmatprep.subr.mxu1 %v1582_v37  ;;  %1584 = vmatpush1.msra.mxu0 %v1579_v36  ;;  %v5553_v36 = vld [vmem:[%s5302_s25 + $0x78] sm:$0xff] }
 0x4a5   : > { %1655 = vmatpush1.msra.mxu1 %v1581_v38  ;;  %4860 = vmatmul.mubr.msk.f32.vlgmr.msra.gmra.mrb[14].mxu0 %vm337_vm0, %v5350_v25 }
 0x4a6   : > { %4861 = vmatmul.mubr.msk.f32.vlgmr.msra.gmra.mrb[14].mxu1 %vm337_vm0, %v5350_v25  ;;  %1853 = vmatprep.mubr.f32.mxu0 %v5240_v0 }
 0x4a7   : > { %1924 = vmatprep.mubr.f32.mxu1 %v5240_v0 }
 0x578   : > { %v1649_v39 = vpop.f32.mrb[14].mxu0 }
 0x579   : > { %v1650_v40 = vadd.f32 %v1649_v39, %v5358_v26  ;;  %v1720_v41 = vpop.f32.mrb[14].mxu1  ;;  %v1651_v42 = vpop.f32.mrb[15].mxu0 }
 0x57a   : > { %v1721_v43 = vadd.f32 %v1720_v41, %v5358_v26  ;;  %v1652_v44 = vadd.f32 %v1651_v42, %v5358_v26  ;;  %v1722_v45 = vpop.f32.mrb[15].mxu1 }
 0x57b   : > { %v4862_v46 = vmul.f32 -1.442695, %v1650_v40  ;;  %v1723_v47 = vadd.f32 %v1722_v45, %v5358_v26 }
 0x57c   : > { %v4864_v48 = vmul.f32 -1.442695, %v1721_v43  ;;  %v4863_v49 = vmul.f32 -1.442695, %v1652_v44  ;;  %v4877_v44 = vld [vmem:[%s5341_s9 + $0x60] sm:$0xff] }
 0x57d   : > { %5118 = vpow2.f32 %v4862_v46  ;;  %v4865_v50 = vmul.f32 -1.442695, %v1723_v47  ;;  %v4879_v47 = vld [vmem:[%s5341_s9 + $0x70] sm:$0xff] }
 0x57e   : > { %5120 = vpow2.f32 %v4864_v48  ;;  %v4878_v48 = vld [vmem:[%s5341_s9 + $0x68] sm:$0xff] }
 0x57f   : > { %5122 = vpow2.f32 %v4863_v49 }
 0x580   : > { %5124 = vpow2.f32 %v4865_v50 }
 0x587   : > { %v5119_v53 = vpop.eup %5118 }
 0x588   : > { %v5121_v54 = vpop.eup %5120  ;;  %v1737_v55 = vadd.f32 1.0, %v5119_v53 }
 0x589   : > { %v5123_v57 = vpop.eup %5122  ;;  %v1739_v58 = vadd.f32 1.0, %v5121_v54  ;;  %v4880_v54 = vld [vmem:[%s5341_s9 + $0x78] sm:$0xff] }
 0x58a   : > { %v5125_v59 = vpop.eup %5124  ;;  %5126 = vrcp.f32 %v1737_v55  ;;  %v1738_v5 = vadd.f32 1.0, %v5123_v57 }
 0x58b   : > { %5128 = vrcp.f32 %v1739_v58  ;;  %v1740_v60 = vadd.f32 1.0, %v5125_v59 }
 0x58c   : > { %5130 = vrcp.f32 %v1738_v5 }
 0x58d   : > { %5132 = vrcp.f32 %v1740_v60 }
 0x594   : > { %v5127_v61 = vpop.eup %5126 }
 0x595   : > { %v5129_v62 = vpop.eup %5128  ;;  %v1752_v28 = vrot.slane %v5127_v61, %v5364_v51  ;;  %v1772_v7 = vrot.slane %v5127_v61, %v5366_v52 }
 0x596   : > { %v5131_v8 = vpop.eup %5130  ;;  %v1760_v9 = vrot.slane %v5129_v62, %v5364_v51  ;;  %v1780_v10 = vrot.slane %v5129_v62, %v5366_v52 }
 0x597   : > { %v5133_v11 = vpop.eup %5132  ;;  %v1944_v12 = vcombine.low %v5127_v61, %v5131_v8  ;;  %v1756_v13 = vrot.slane %v5131_v8, %v5364_v51  ;;  %v1776_v14 = vrot.slane %v5131_v8, %v5366_v52  ;;  %v1765_v15 = vmul.f32 %v5489_v29, %v1752_v28 }
 0x598   : > { %v1945_v16 = vcombine.low %v5129_v62, %v5133_v11  ;;  %v1764_v17 = vrot.slane %v5133_v11, %v5364_v51  ;;  %v1784_v18 = vrot.slane %v5133_v11, %v5366_v52  ;;  %v1785_v19 = vmul.f32 %v5489_v29, %v1772_v7 }
 0x599   : > { %v1952_v20 = vrot.slane %v1944_v12, %v5368_v56  ;;  %v1766_v21 = vmul.f32 %v5481_v63, %v1756_v13  ;;  %v1786_v22 = vmul.f32 %v5481_v63, %v1776_v14  ;;  %v1767_v4 = vmul.f32 %v5493_v31, %v1760_v9 }
 0x59a   : > { %v1959_v23 = vrot.slane %v1945_v16, %v5368_v56  ;;  %v1768_v2 = vmul.f32 %v5484_v6, %v1764_v17  ;;  %v1788_v24 = vmul.f32 %v5484_v6, %v1784_v18  ;;  %v1787_v29 = vmul.f32 %v5493_v31, %v1780_v10  ;;  %v5558_v6 = vld [vmem:[%s5302_s25 + $0x60] sm:$0xff]  ;;  %v5562_v31 = vld [vmem:[%s5302_s25 + $0x70] sm:$0xff] }
 0x59b   : > { %v5010_v27 = vpack.c.bf16 %v1786_v22, %v1766_v21  ;;  %v5012_v33 = vpack.c.bf16 %v1785_v19, %v1765_v15 }
 0x59c   : > { %v1960_v3 = vcombine.low %v1952_v20, %v1959_v23  ;;  %v5014_v32 = vpack.c.bf16 %v1788_v24, %v1768_v2  ;;  %v5016_v63 = vpack.c.bf16 %v1787_v29, %v1767_v4 }
 0x59d   : > { %5011 = vmatprep.subr.bf16.mxu0 %v5010_v27 }
 0x59e   : > { %4872 = vst [vmem:[%s5395_s17 + $0x10] sm:$0xff] %v1960_v3  ;;  %5015 = vmatprep.subr.bf16.mxu1 %v5014_v32  ;;  %5013 = vmatpush1.bf16.msra.mxu0 %v5012_v33 }
 0x59f   : > { %5017 = vmatpush1.bf16.msra.mxu1 %v5016_v63  ;;  %1974 = vmatprep.subr.mxu0 %v5550_v34 }
 0x5a0   : > { %2045 = vmatprep.subr.mxu1 %v5553_v36 }
 0x5a1   : > { %4866 = vmatmul.mubr.msk.f32.vlgmr.msra.gmra.mrb[16].mxu0 %vm714_vm2, %v5406_v30 }
 0x5a2   : > { %4867 = vmatmul.mubr.msk.f32.vlgmr.msra.gmra.mrb[16].mxu1 %vm714_vm2, %v5406_v30  ;;  %1975 = vmatpush1.msra.mxu0 %v5558_v6 }
 0x5a3   : > { %2038 = vmatprep.mubr.f32.mxu0 %v5240_v0  ;;  %2046 = vmatpush1.msra.mxu1 %v5562_v31 }
 0x5a4   : > { %2109 = vmatprep.mubr.f32.mxu1 %v5240_v0 }
 0x5a5   : > { %4881 = vmatmul.mubr.msk.f32.vlgmr.msra.gmra.mrb[18].mxu0 %vm337_vm0, %v5307_v1 }
 0x5a6   : > { %4882 = vmatmul.mubr.msk.f32.vlgmr.msra.gmra.mrb[18].mxu1 %vm337_vm0, %v5307_v1  ;;  %2184 = vmatprep.mubr.f32.mxu0 %v5240_v0 }
 0x5a7   : > { %2255 = vmatprep.mubr.f32.mxu1 %v5240_v0 }
 0x674   : > { %v1855_v37 = vpop.f32.mrb[16].mxu0 }
 0x675   : > { %v1856_v38 = vadd.f32 %v1855_v37, %v5432_v35  ;;  %v1926_v39 = vpop.f32.mrb[16].mxu1  ;;  %v1857_v40 = vpop.f32.mrb[17].mxu0 }
 0x676   : > { %v1927_v41 = vadd.f32 %v1926_v39, %v5432_v35  ;;  %v1858_v42 = vadd.f32 %v1857_v40, %v5432_v35  ;;  %v1928_v43 = vpop.f32.mrb[17].mxu1 }
 0x677   : > { %v1931_v45 = vmax.f32 %v1856_v38, 0.0  ;;  %v1929_v46 = vadd.f32 %v1928_v43, %v5432_v35 }
 0x678   : > { %v1933_v49 = vmax.f32 %v1927_v41, 0.0  ;;  %v1932_v50 = vmax.f32 %v1858_v42, 0.0  ;;  %v2040_v53 = vpop.f32.mrb[18].mxu0 }
 0x679   : > { %4868 = vst [vmem:[%s5439_s24 + $0x40] sm:$0xff] %v1931_v45  ;;  %v1934_v55 = vmax.f32 %v1929_v46, 0.0  ;;  %v2041_v57 = vadd.f32 %v4877_v44, %v2040_v53  ;;  %v2111_v58 = vpop.f32.mrb[18].mxu1  ;;  %v2042_v59 = vpop.f32.mrb[19].mxu0 }
 0x67a   : > { %4870 = vst [vmem:[%s5439_s24 + $0x50] sm:$0xff] %v1933_v49  ;;  %4869 = vst [vmem:[%s5439_s24 + $0x48] sm:$0xff] %v1932_v50  ;;  %v2112_v5 = vadd.f32 %v4879_v47, %v2111_v58  ;;  %v2043_v60 = vadd.f32 %v4878_v48, %v2042_v59  ;;  %v2113_v61 = vpop.f32.mrb[19].mxu1 }
 0x67b   : > { %4871 = vst [vmem:[%s5439_s24 + $0x58] sm:$0xff] %v1934_v55  ;;  %v2114_v62 = vadd.f32 %v4880_v54, %v2113_v61  ;;  %v2116_v7 = vmax.f32 %v2041_v57, 0.0 }
 0x67c   : > { %v2117_v28 = vmax.f32 %v2043_v60, 0.0  ;;  %v2118_v9 = vmax.f32 %v2112_v5, 0.0 }
 0x67d   : > { %v2119_v8 = vmax.f32 %v2114_v62, 0.0 }
 0x67e   : > { %2120 = vmatprep.subr.mxu0 %v2117_v28  ;;  %v5619_v28 = vld [vmem:[%s5302_s25 + $0x88] sm:$0xff] }
 0x67f   : > { %2191 = vmatprep.subr.mxu1 %v2119_v8  ;;  %2121 = vmatpush1.msra.mxu0 %v2116_v7  ;;  %v5622_v7 = vld [vmem:[%s5302_s25 + $0x98] sm:$0xff] }
 0x680   : > { %2192 = vmatpush1.msra.mxu1 %v2118_v9  ;;  %4883 = vmatmul.mubr.msk.f32.vlgmr.msra.gmra.mrb[20].mxu0 %vm337_vm0, %v5350_v25 }
 0x681   : > { %4884 = vmatmul.mubr.msk.f32.vlgmr.msra.gmra.mrb[20].mxu1 %vm337_vm0, %v5350_v25  ;;  %2390 = vmatprep.mubr.f32.mxu0 %v5240_v0 }
 0x682   : > { %2461 = vmatprep.mubr.f32.mxu1 %v5240_v0 }
 0x753   : > { %v2186_v10 = vpop.f32.mrb[20].mxu0 }
 0x754   : > { %v2187_v11 = vadd.f32 %v2186_v10, %v5358_v26  ;;  %v2257_v12 = vpop.f32.mrb[20].mxu1  ;;  %v2188_v13 = vpop.f32.mrb[21].mxu0 }
 0x755   : > { %v2258_v14 = vadd.f32 %v2257_v12, %v5358_v26  ;;  %v2189_v15 = vadd.f32 %v2188_v13, %v5358_v26  ;;  %v2259_v16 = vpop.f32.mrb[21].mxu1 }
 0x756   : > { %v4885_v17 = vmul.f32 -1.442695, %v2187_v11  ;;  %v2260_v18 = vadd.f32 %v2259_v16, %v5358_v26 }
 0x757   : > { %v4887_v19 = vmul.f32 -1.442695, %v2258_v14  ;;  %v4886_v20 = vmul.f32 -1.442695, %v2189_v15  ;;  %v4900_v15 = vld [vmem:[%s5341_s9 + $0x80] sm:$0xff] }
 0x758   : > { %5134 = vpow2.f32 %v4885_v17  ;;  %v4888_v21 = vmul.f32 -1.442695, %v2260_v18  ;;  %v4902_v17 = vld [vmem:[%s5341_s9 + $0x90] sm:$0xff]  ;;  %v4901_v18 = vld [vmem:[%s5341_s9 + $0x88] sm:$0xff] }
 0x759   : > { %5136 = vpow2.f32 %v4887_v19 }
 0x75a   : > { %5138 = vpow2.f32 %v4886_v20 }
 0x75b   : > { %5140 = vpow2.f32 %v4888_v21 }
 0x762   : > { %v5135_v22 = vpop.eup %5134 }
 0x763   : > { %v5137_v4 = vpop.eup %5136  ;;  %v2274_v23 = vadd.f32 1.0, %v5135_v22  ;;  %v4903_v22 = vld [vmem:[%s5341_s9 + $0x98] sm:$0xff] }
 0x764   : > { %v5139_v2 = vpop.eup %5138  ;;  %v2276_v24 = vadd.f32 1.0, %v5137_v4 }
 0x765   : > { %v5141_v27 = vpop.eup %5140  ;;  %5142 = vrcp.f32 %v2274_v23  ;;  %v2275_v29 = vadd.f32 1.0, %v5139_v2 }
 0x766   : > { %5144 = vrcp.f32 %v2276_v24  ;;  %v2277_v3 = vadd.f32 1.0, %v5141_v27 }
 0x767   : > { %5146 = vrcp.f32 %v2275_v29 }
 0x768   : > { %5148 = vrcp.f32 %v2277_v3 }
 0x76f   : > { %v5143_v32 = vpop.eup %5142 }
 0x770   : > { %v5145_v33 = vpop.eup %5144  ;;  %v2289_v63 = vrot.slane %v5143_v32, %v5364_v51  ;;  %v2309_v37 = vrot.slane %v5143_v32, %v5366_v52 }
 0x771   : > { %v5147_v38 = vpop.eup %5146  ;;  %v2297_v39 = vrot.slane %v5145_v33, %v5364_v51  ;;  %v2317_v40 = vrot.slane %v5145_v33, %v5366_v52 }
 0x772   : > { %v5149_v41 = vpop.eup %5148  ;;  %v2481_v42 = vcombine.low %v5143_v32, %v5147_v38  ;;  %v2293_v43 = vrot.slane %v5147_v38, %v5364_v51  ;;  %v2313_v44 = vrot.slane %v5147_v38, %v5366_v52  ;;  %v2302_v45 = vmul.f32 %v5558_v6, %v2289_v63 }
 0x773   : > { %v2482_v46 = vcombine.low %v5145_v33, %v5149_v41  ;;  %v2301_v47 = vrot.slane %v5149_v41, %v5364_v51  ;;  %v2321_v48 = vrot.slane %v5149_v41, %v5366_v52  ;;  %v2322_v49 = vmul.f32 %v5558_v6, %v2309_v37 }
 0x774   : > { %v2489_v50 = vrot.slane %v2481_v42, %v5368_v56  ;;  %v2303_v53 = vmul.f32 %v5550_v34, %v2293_v43  ;;  %v2323_v54 = vmul.f32 %v5550_v34, %v2313_v44  ;;  %v2304_v55 = vmul.f32 %v5562_v31, %v2297_v39 }
 0x775   : > { %v2496_v57 = vrot.slane %v2482_v46, %v5368_v56  ;;  %v2305_v58 = vmul.f32 %v5553_v36, %v2301_v47  ;;  %v2325_v59 = vmul.f32 %v5553_v36, %v2321_v48  ;;  %v2324_v6 = vmul.f32 %v5562_v31, %v2317_v40  ;;  %v5627_v36 = vld [vmem:[%s5302_s25 + $0x80] sm:$0xff]  ;;  %v5631_v31 = vld [vmem:[%s5302_s25 + $0x90] sm:$0xff] }
 0x776   : > { %v5018_v5 = vpack.c.bf16 %v2323_v54, %v2303_v53  ;;  %v5020_v62 = vpack.c.bf16 %v2322_v49, %v2302_v45 }
 0x777   : > { %v2497_v60 = vcombine.low %v2489_v50, %v2496_v57  ;;  %v5022_v61 = vpack.c.bf16 %v2325_v59, %v2305_v58  ;;  %v5024_v34 = vpack.c.bf16 %v2324_v6, %v2304_v55 }
 0x778   : > { %5019 = vmatprep.subr.bf16.mxu0 %v5018_v5 }
 0x779   : > { %4895 = vst [vmem:[%s5395_s17 + $0x18] sm:$0xff] %v2497_v60  ;;  %5023 = vmatprep.subr.bf16.mxu1 %v5022_v61  ;;  %5021 = vmatpush1.bf16.msra.mxu0 %v5020_v62 }
 0x77a   : > { %5025 = vmatpush1.bf16.msra.mxu1 %v5024_v34  ;;  %2511 = vmatprep.subr.mxu0 %v5619_v28 }
 0x77b   : > { %2582 = vmatprep.subr.mxu1 %v5622_v7 }
 0x77c   : > { %4889 = vmatmul.mubr.msk.f32.vlgmr.msra.gmra.mrb[22].mxu0 %vm714_vm2, %v5406_v30 }
 0x77d   : > { %4890 = vmatmul.mubr.msk.f32.vlgmr.msra.gmra.mrb[22].mxu1 %vm714_vm2, %v5406_v30  ;;  %2512 = vmatpush1.msra.mxu0 %v5627_v36 }
 0x77e   : > { %2575 = vmatprep.mubr.f32.mxu0 %v5240_v0  ;;  %2583 = vmatpush1.msra.mxu1 %v5631_v31 }
 0x77f   : > { %2646 = vmatprep.mubr.f32.mxu1 %v5240_v0 }
 0x780   : > { %4904 = vmatmul.mubr.msk.f32.vlgmr.msra.gmra.mrb[24].mxu0 %vm337_vm0, %v5307_v1 }
 0x781   : > { %4905 = vmatmul.mubr.msk.f32.vlgmr.msra.gmra.mrb[24].mxu1 %vm337_vm0, %v5307_v1  ;;  %2721 = vmatprep.mubr.f32.mxu0 %v5240_v0 }
 0x782   : > { %2792 = vmatprep.mubr.f32.mxu1 %v5240_v0 }
 0x84f   : > { %v2392_v8 = vpop.f32.mrb[22].mxu0 }
 0x850   : > { %v2393_v9 = vadd.f32 %v2392_v8, %v5432_v35  ;;  %v2463_v10 = vpop.f32.mrb[22].mxu1  ;;  %v2394_v11 = vpop.f32.mrb[23].mxu0 }
 0x851   : > { %v2464_v12 = vadd.f32 %v2463_v10, %v5432_v35  ;;  %v2395_v13 = vadd.f32 %v2394_v11, %v5432_v35  ;;  %v2465_v14 = vpop.f32.mrb[23].mxu1 }
 0x852   : > { %v2468_v1 = vmax.f32 %v2393_v9, 0.0  ;;  %v2466_v16 = vadd.f32 %v2465_v14, %v5432_v35 }
 0x853   : > { %v2470_v19 = vmax.f32 %v2464_v12, 0.0  ;;  %v2469_v20 = vmax.f32 %v2395_v13, 0.0  ;;  %v2577_v21 = vpop.f32.mrb[24].mxu0 }
 0x854   : > { %4891 = vst [vmem:[%s5439_s24 + $0x60] sm:$0xff] %v2468_v1  ;;  %v2471_v4 = vmax.f32 %v2466_v16, 0.0  ;;  %v2578_v23 = vadd.f32 %v4900_v15, %v2577_v21  ;;  %v2648_v2 = vpop.f32.mrb[24].mxu1  ;;  %v2579_v24 = vpop.f32.mrb[25].mxu0 }
 0x855   : > { %4893 = vst [vmem:[%s5439_s24 + $0x70] sm:$0xff] %v2470_v19  ;;  %4892 = vst [vmem:[%s5439_s24 + $0x68] sm:$0xff] %v2469_v20  ;;  %v2649_v27 = vadd.f32 %v4902_v17, %v2648_v2  ;;  %v2580_v29 = vadd.f32 %v4901_v18, %v2579_v24  ;;  %v2650_v3 = vpop.f32.mrb[25].mxu1 }
 0x856   : > { %4894 = vst [vmem:[%s5439_s24 + $0x78] sm:$0xff] %v2471_v4  ;;  %v2651_v32 = vadd.f32 %v4903_v22, %v2650_v3  ;;  %v2653_v63 = vmax.f32 %v2578_v23, 0.0  ;;  %v5688_v3 = vld [vmem:[%s5302_s25 + $0xa8] sm:$0xff] }
 0x857   : > { %v2654_v33 = vmax.f32 %v2580_v29, 0.0  ;;  %v2655_v38 = vmax.f32 %v2649_v27, 0.0 }
 0x858   : > { %v2656_v37 = vmax.f32 %v2651_v32, 0.0  ;;  %v5691_v32 = vld [vmem:[%s5302_s25 + $0xb8] sm:$0xff] }
 0x859   : > { %2657 = vmatprep.subr.mxu0 %v2654_v33  ;;  %v5713_v33 = vld [vmem:[%s5928_s2] sm:$0xff] }
 0x85a   : > { %2728 = vmatprep.subr.mxu1 %v2656_v37  ;;  %2658 = vmatpush1.msra.mxu0 %v2653_v63 }
 0x85b   : > { %2729 = vmatpush1.msra.mxu1 %v2655_v38  ;;  %4906 = vmatmul.mubr.msk.f32.vlgmr.msra.gmra.mrb[26].mxu0 %vm337_vm0, %v5350_v25 }
 0x85c   : > { %4907 = vmatmul.mubr.msk.f32.vlgmr.msra.gmra.mrb[26].mxu1 %vm337_vm0, %v5350_v25  ;;  %2927 = vmatprep.mubr.f32.mxu0 %v5240_v0 }
 0x85d   : > { %2998 = vmatprep.mubr.f32.mxu1 %v5240_v0 }
 0x92e   : > { %v2723_v39 = vpop.f32.mrb[26].mxu0 }
 0x92f   : > { %v2724_v40 = vadd.f32 %v2723_v39, %v5358_v26  ;;  %v2794_v41 = vpop.f32.mrb[26].mxu1  ;;  %v2725_v42 = vpop.f32.mrb[27].mxu0 }
 0x930   : > { %v2795_v43 = vadd.f32 %v2794_v41, %v5358_v26  ;;  %v2726_v44 = vadd.f32 %v2725_v42, %v5358_v26  ;;  %v2796_v45 = vpop.f32.mrb[27].mxu1 }
 0x931   : > { %v4908_v46 = vmul.f32 -1.442695, %v2724_v40  ;;  %v2797_v47 = vadd.f32 %v2796_v45, %v5358_v26 }
 0x932   : > { %v4910_v48 = vmul.f32 -1.442695, %v2795_v43  ;;  %v4909_v49 = vmul.f32 -1.442695, %v2726_v44  ;;  %v4923_v43 = vld [vmem:[%s5341_s9 + $0xa0] sm:$0xff] }
 0x933   : > { %5150 = vpow2.f32 %v4908_v46  ;;  %v4911_v25 = vmul.f32 -1.442695, %v2797_v47  ;;  %v4925_v46 = vld [vmem:[%s5341_s9 + $0xb0] sm:$0xff]  ;;  %v4924_v47 = vld [vmem:[%s5341_s9 + $0xa8] sm:$0xff] }
 0x934   : > { %5152 = vpow2.f32 %v4910_v48 }
 0x935   : > { %5154 = vpow2.f32 %v4909_v49 }
 0x936   : > { %5156 = vpow2.f32 %v4911_v25 }
 0x93d   : > { %v5151_v50 = vpop.eup %5150 }
 0x93e   : > { %v5153_v53 = vpop.eup %5152  ;;  %v2811_v54 = vadd.f32 1.0, %v5151_v50  ;;  %v4926_v50 = vld [vmem:[%s5341_s9 + $0xb8] sm:$0xff] }
 0x93f   : > { %v5155_v55 = vpop.eup %5154  ;;  %v2813_v57 = vadd.f32 1.0, %v5153_v53 }
 0x940   : > { %v5157_v58 = vpop.eup %5156  ;;  %5158 = vrcp.f32 %v2811_v54  ;;  %v2812_v59 = vadd.f32 1.0, %v5155_v55 }
 0x941   : > { %5160 = vrcp.f32 %v2813_v57  ;;  %v2814_v5 = vadd.f32 1.0, %v5157_v58 }
 0x942   : > { %5162 = vrcp.f32 %v2812_v59 }
 0x943   : > { %5164 = vrcp.f32 %v2814_v5 }
 0x94a   : > { %v5159_v6 = vpop.eup %5158 }
 0x94b   : > { %v5161_v60 = vpop.eup %5160  ;;  %v2826_v61 = vrot.slane %v5159_v6, %v5364_v51  ;;  %v2846_v62 = vrot.slane %v5159_v6, %v5366_v52 }
 0x94c   : > { %v5163_v34 = vpop.eup %5162  ;;  %v2834_v8 = vrot.slane %v5161_v60, %v5364_v51  ;;  %v2854_v9 = vrot.slane %v5161_v60, %v5366_v52 }
 0x94d   : > { %v5165_v10 = vpop.eup %5164  ;;  %v3018_v11 = vcombine.low %v5159_v6, %v5163_v34  ;;  %v2830_v12 = vrot.slane %v5163_v34, %v5364_v51  ;;  %v2850_v13 = vrot.slane %v5163_v34, %v5366_v52  ;;  %v2839_v14 = vmul.f32 %v5627_v36, %v2826_v61 }
 0x94e   : > { %v3019_v15 = vcombine.low %v5161_v60, %v5165_v10  ;;  %v2838_v1 = vrot.slane %v5165_v10, %v5364_v51  ;;  %v2858_v16 = vrot.slane %v5165_v10, %v5366_v52  ;;  %v2859_v17 = vmul.f32 %v5627_v36, %v2846_v62 }
 0x94f   : > { %v3026_v18 = vrot.slane %v3018_v11, %v5368_v56  ;;  %v2840_v19 = vmul.f32 %v5619_v28, %v2830_v12  ;;  %v2860_v20 = vmul.f32 %v5619_v28, %v2850_v13  ;;  %v2841_v21 = vmul.f32 %v5631_v31, %v2834_v8  ;;  %v5736_v8 = vld [vmem:[%s5928_s2 + $0x8] sm:$0xff] }
 0x950   : > { %v3033_v22 = vrot.slane %v3019_v15, %v5368_v56  ;;  %v2842_v4 = vmul.f32 %v5622_v7, %v2838_v1  ;;  %v2862_v23 = vmul.f32 %v5622_v7, %v2858_v16  ;;  %v2861_v36 = vmul.f32 %v5631_v31, %v2854_v9  ;;  %v5696_v7 = vld [vmem:[%s5302_s25 + $0xa0] sm:$0xff]  ;;  %v5700_v31 = vld [vmem:[%s5302_s25 + $0xb0] sm:$0xff] }
 0x951   : > { %v5026_v2 = vpack.c.bf16 %v2860_v20, %v2840_v19  ;;  %v5028_v29 = vpack.c.bf16 %v2859_v17, %v2839_v14 }
 0x952   : > { %v3034_v24 = vcombine.low %v3026_v18, %v3033_v22  ;;  %v5030_v27 = vpack.c.bf16 %v2862_v23, %v2842_v4  ;;  %v5032_v28 = vpack.c.bf16 %v2861_v36, %v2841_v21 }
 0x953   : > { %5027 = vmatprep.subr.bf16.mxu0 %v5026_v2 }
 0x954   : > { %4918 = vst [vmem:[%s5395_s17 + $0x20] sm:$0xff] %v3034_v24  ;;  %5031 = vmatprep.subr.bf16.mxu1 %v5030_v27  ;;  %5029 = vmatpush1.bf16.msra.mxu0 %v5028_v29 }
 0x955   : > { %5033 = vmatpush1.bf16.msra.mxu1 %v5032_v28  ;;  %3048 = vmatprep.subr.mxu0 %v5688_v3 }
 0x956   : > { %3119 = vmatprep.subr.mxu1 %v5691_v32 }
 0x957   : > { %4912 = vmatmul.mubr.msk.f32.vlgmr.msra.gmra.mrb[28].mxu0 %vm714_vm2, %v5406_v30 }
 0x958   : > { %4913 = vmatmul.mubr.msk.f32.vlgmr.msra.gmra.mrb[28].mxu1 %vm714_vm2, %v5406_v30  ;;  %3049 = vmatpush1.msra.mxu0 %v5696_v7 }
 0x959   : > { %3112 = vmatprep.mubr.f32.mxu0 %v5240_v0  ;;  %3120 = vmatpush1.msra.mxu1 %v5700_v31 }
 0x95a   : > { %3183 = vmatprep.mubr.f32.mxu1 %v5240_v0 }
 0x95b   : > { %4927 = vmatmul.mubr.msk.f32.vlgmr.msra.gmra.mrb[30].mxu0 %vm337_vm0, %v5713_v33 }
 0x95c   : > { %4928 = vmatmul.mubr.msk.f32.vlgmr.msra.gmra.mrb[30].mxu1 %vm337_vm0, %v5713_v33  ;;  %3258 = vmatprep.mubr.f32.mxu0 %v5240_v0 }
 0x95d   : > { %3329 = vmatprep.mubr.f32.mxu1 %v5240_v0 }
 0xa2a   : > { %v2929_v63 = vpop.f32.mrb[28].mxu0 }
 0xa2b   : > { %v2930_v37 = vadd.f32 %v2929_v63, %v5432_v35  ;;  %v3000_v38 = vpop.f32.mrb[28].mxu1  ;;  %v2931_v39 = vpop.f32.mrb[29].mxu0 }
 0xa2c   : > { %v3001_v40 = vadd.f32 %v3000_v38, %v5432_v35  ;;  %v2932_v41 = vadd.f32 %v2931_v39, %v5432_v35  ;;  %v3002_v42 = vpop.f32.mrb[29].mxu1 }
 0xa2d   : > { %v3005_v44 = vmax.f32 %v2930_v37, 0.0  ;;  %v3003_v45 = vadd.f32 %v3002_v42, %v5432_v35 }
 0xa2e   : > { %v3007_v48 = vmax.f32 %v3001_v40, 0.0  ;;  %v3006_v49 = vmax.f32 %v2932_v41, 0.0  ;;  %v3114_v25 = vpop.f32.mrb[30].mxu0 }
 0xa2f   : > { %4914 = vst [vmem:[%s5439_s24 + $0x80] sm:$0xff] %v3005_v44  ;;  %v3008_v53 = vmax.f32 %v3003_v45, 0.0  ;;  %v3115_v54 = vadd.f32 %v4923_v43, %v3114_v25  ;;  %v3185_v55 = vpop.f32.mrb[30].mxu1  ;;  %v3116_v57 = vpop.f32.mrb[31].mxu0 }
 0xa30   : > { %4916 = vst [vmem:[%s5439_s24 + $0x90] sm:$0xff] %v3007_v48  ;;  %4915 = vst [vmem:[%s5439_s24 + $0x88] sm:$0xff] %v3006_v49  ;;  %v3186_v58 = vadd.f32 %v4925_v46, %v3185_v55  ;;  %v3117_v59 = vadd.f32 %v4924_v47, %v3116_v57  ;;  %v3187_v5 = vpop.f32.mrb[31].mxu1 }
 0xa31   : > { %4917 = vst [vmem:[%s5439_s24 + $0x98] sm:$0xff] %v3008_v53  ;;  %v3188_v6 = vadd.f32 %v4926_v50, %v3187_v5  ;;  %v3190_v61 = vmax.f32 %v3115_v54, 0.0 }
 0xa32   : > { %v3191_v60 = vmax.f32 %v3117_v59, 0.0  ;;  %v3192_v34 = vmax.f32 %v3186_v58, 0.0 }
 0xa33   : > { %v3193_v62 = vmax.f32 %v3188_v6, 0.0 }
 0xa34   : > { %3194 = vmatprep.subr.mxu0 %v3191_v60  ;;  %v5767_v60 = vld [vmem:[%s5302_s25 + $0xc8] sm:$0xff] }
 0xa35   : > { %3265 = vmatprep.subr.mxu1 %v3193_v62  ;;  %3195 = vmatpush1.msra.mxu0 %v3190_v61  ;;  %v5770_v61 = vld [vmem:[%s5302_s25 + $0xd8] sm:$0xff] }
 0xa36   : > { %3266 = vmatpush1.msra.mxu1 %v3192_v34  ;;  %4929 = vmatmul.mubr.msk.f32.vlgmr.msra.gmra.mrb[32].mxu0 %vm337_vm0, %v5736_v8 }
 0xa37   : > { %4930 = vmatmul.mubr.msk.f32.vlgmr.msra.gmra.mrb[32].mxu1 %vm337_vm0, %v5736_v8  ;;  %3464 = vmatprep.mubr.f32.mxu0 %v5240_v0 }
 0xa38   : > { %3535 = vmatprep.mubr.f32.mxu1 %v5240_v0 }
 0xb09   : > { %v3260_v9 = vpop.f32.mrb[32].mxu0 }
 0xb0a   : > { %v3261_v10 = vadd.f32 %v3260_v9, %v5358_v26  ;;  %v3331_v11 = vpop.f32.mrb[32].mxu1  ;;  %v3262_v12 = vpop.f32.mrb[33].mxu0 }
 0xb0b   : > { %v3332_v13 = vadd.f32 %v3331_v11, %v5358_v26  ;;  %v3263_v14 = vadd.f32 %v3262_v12, %v5358_v26  ;;  %v3333_v15 = vpop.f32.mrb[33].mxu1 }
 0xb0c   : > { %v4931_v1 = vmul.f32 -1.442695, %v3261_v10  ;;  %v3334_v16 = vadd.f32 %v3333_v15, %v5358_v26 }
 0xb0d   : > { %v4933_v17 = vmul.f32 -1.442695, %v3332_v13  ;;  %v4932_v18 = vmul.f32 -1.442695, %v3263_v14  ;;  %v4946_v14 = vld [vmem:[%s5341_s9 + $0xc0] sm:$0xff] }
 0xb0e   : > { %5166 = vpow2.f32 %v4931_v1  ;;  %v4934_v19 = vmul.f32 -1.442695, %v3334_v16  ;;  %v4948_v16 = vld [vmem:[%s5341_s9 + $0xd0] sm:$0xff] }
 0xb0f   : > { %5168 = vpow2.f32 %v4933_v17  ;;  %v4947_v17 = vld [vmem:[%s5341_s9 + $0xc8] sm:$0xff] }
 0xb10   : > { %5170 = vpow2.f32 %v4932_v18 }
 0xb11   : > { %5172 = vpow2.f32 %v4934_v19 }
 0xb18   : > { %v5167_v20 = vpop.eup %5166 }
 0xb19   : > { %v5169_v21 = vpop.eup %5168  ;;  %v3348_v22 = vadd.f32 1.0, %v5167_v20 }
 0xb1a   : > { %v5171_v4 = vpop.eup %5170  ;;  %v3350_v23 = vadd.f32 1.0, %v5169_v21  ;;  %v4949_v21 = vld [vmem:[%s5341_s9 + $0xd8] sm:$0xff] }
 0xb1b   : > { %v5173_v2 = vpop.eup %5172  ;;  %5174 = vrcp.f32 %v3348_v22  ;;  %v3349_v36 = vadd.f32 1.0, %v5171_v4 }
 0xb1c   : > { %5176 = vrcp.f32 %v3350_v23  ;;  %v3351_v24 = vadd.f32 1.0, %v5173_v2 }
 0xb1d   : > { %5178 = vrcp.f32 %v3349_v36 }
 0xb1e   : > { %5180 = vrcp.f32 %v3351_v24 }
 0xb25   : > { %v5175_v27 = vpop.eup %5174 }
 0xb26   : > { %v5177_v29 = vpop.eup %5176  ;;  %v3363_v28 = vrot.slane %v5175_v27, %v5364_v51  ;;  %v3383_v63 = vrot.slane %v5175_v27, %v5366_v52 }
 0xb27   : > { %v5179_v37 = vpop.eup %5178  ;;  %v3371_v38 = vrot.slane %v5177_v29, %v5364_v51  ;;  %v3391_v39 = vrot.slane %v5177_v29, %v5366_v52 }
 0xb28   : > { %v5181_v40 = vpop.eup %5180  ;;  %v3555_v41 = vcombine.low %v5175_v27, %v5179_v37  ;;  %v3367_v42 = vrot.slane %v5179_v37, %v5364_v51  ;;  %v3387_v43 = vrot.slane %v5179_v37, %v5366_v52  ;;  %v3376_v44 = vmul.f32 %v5696_v7, %v3363_v28 }
 0xb29   : > { %v3556_v45 = vcombine.low %v5177_v29, %v5181_v40  ;;  %v3375_v46 = vrot.slane %v5181_v40, %v5364_v51  ;;  %v3395_v47 = vrot.slane %v5181_v40, %v5366_v52  ;;  %v3396_v48 = vmul.f32 %v5696_v7, %v3383_v63 }
 0xb2a   : > { %v3563_v49 = vrot.slane %v3555_v41, %v5368_v56  ;;  %v3377_v25 = vmul.f32 %v5688_v3, %v3367_v42  ;;  %v3397_v50 = vmul.f32 %v5688_v3, %v3387_v43  ;;  %v3378_v53 = vmul.f32 %v5700_v31, %v3371_v38 }
 0xb2b   : > { %v3570_v54 = vrot.slane %v3556_v45, %v5368_v56  ;;  %v3379_v55 = vmul.f32 %v5691_v32, %v3375_v46  ;;  %v3399_v57 = vmul.f32 %v5691_v32, %v3395_v47  ;;  %v3398_v7 = vmul.f32 %v5700_v31, %v3391_v39  ;;  %v5775_v32 = vld [vmem:[%s5302_s25 + $0xc0] sm:$0xff]  ;;  %v5779_v31 = vld [vmem:[%s5302_s25 + $0xd0] sm:$0xff] }
 0xb2c   : > { %v5034_v58 = vpack.c.bf16 %v3397_v50, %v3377_v25  ;;  %v5036_v6 = vpack.c.bf16 %v3396_v48, %v3376_v44 }
 0xb2d   : > { %v3571_v59 = vcombine.low %v3563_v49, %v3570_v54  ;;  %v5038_v5 = vpack.c.bf16 %v3399_v57, %v3379_v55  ;;  %v5040_v3 = vpack.c.bf16 %v3398_v7, %v3378_v53 }
 0xb2e   : > { %5035 = vmatprep.subr.bf16.mxu0 %v5034_v58 }
 0xb2f   : > { %4941 = vst [vmem:[%s5395_s17 + $0x28] sm:$0xff] %v3571_v59  ;;  %5039 = vmatprep.subr.bf16.mxu1 %v5038_v5  ;;  %5037 = vmatpush1.bf16.msra.mxu0 %v5036_v6 }
 0xb30   : > { %5041 = vmatpush1.bf16.msra.mxu1 %v5040_v3  ;;  %3585 = vmatprep.subr.mxu0 %v5767_v60 }
 0xb31   : > { %3656 = vmatprep.subr.mxu1 %v5770_v61 }
 0xb32   : > { %4935 = vmatmul.mubr.msk.f32.vlgmr.msra.gmra.mrb[34].mxu0 %vm714_vm2, %v5406_v30 }
 0xb33   : > { %4936 = vmatmul.mubr.msk.f32.vlgmr.msra.gmra.mrb[34].mxu1 %vm714_vm2, %v5406_v30  ;;  %3586 = vmatpush1.msra.mxu0 %v5775_v32 }
 0xb34   : > { %3649 = vmatprep.mubr.f32.mxu0 %v5240_v0  ;;  %3657 = vmatpush1.msra.mxu1 %v5779_v31 }
 0xb35   : > { %3720 = vmatprep.mubr.f32.mxu1 %v5240_v0 }
 0xb36   : > { %4950 = vmatmul.mubr.msk.f32.vlgmr.msra.gmra.mrb[36].mxu0 %vm337_vm0, %v5713_v33 }
 0xb37   : > { %4951 = vmatmul.mubr.msk.f32.vlgmr.msra.gmra.mrb[36].mxu1 %vm337_vm0, %v5713_v33  ;;  %3795 = vmatprep.mubr.f32.mxu0 %v5240_v0 }
 0xb38   : > { %3866 = vmatprep.mubr.f32.mxu1 %v5240_v0 }
 0xc05   : > { %v3466_v62 = vpop.f32.mrb[34].mxu0 }
 0xc06   : > { %v3467_v34 = vadd.f32 %v3466_v62, %v5432_v35  ;;  %v3537_v9 = vpop.f32.mrb[34].mxu1  ;;  %v3468_v10 = vpop.f32.mrb[35].mxu0 }
 0xc07   : > { %v3538_v11 = vadd.f32 %v3537_v9, %v5432_v35  ;;  %v3469_v12 = vadd.f32 %v3468_v10, %v5432_v35  ;;  %v3539_v13 = vpop.f32.mrb[35].mxu1 }
 0xc08   : > { %v3542_v15 = vmax.f32 %v3467_v34, 0.0  ;;  %v3540_v1 = vadd.f32 %v3539_v13, %v5432_v35 }
 0xc09   : > { %v3544_v18 = vmax.f32 %v3538_v11, 0.0  ;;  %v3543_v19 = vmax.f32 %v3469_v12, 0.0  ;;  %v3651_v20 = vpop.f32.mrb[36].mxu0 }
 0xc0a   : > { %4937 = vst [vmem:[%s5439_s24 + $0xa0] sm:$0xff] %v3542_v15  ;;  %v3545_v22 = vmax.f32 %v3540_v1, 0.0  ;;  %v3652_v4 = vadd.f32 %v4946_v14, %v3651_v20  ;;  %v3722_v23 = vpop.f32.mrb[36].mxu1  ;;  %v3653_v2 = vpop.f32.mrb[37].mxu0 }
 0xc0b   : > { %4939 = vst [vmem:[%s5439_s24 + $0xb0] sm:$0xff] %v3544_v18  ;;  %4938 = vst [vmem:[%s5439_s24 + $0xa8] sm:$0xff] %v3543_v19  ;;  %v3723_v36 = vadd.f32 %v4948_v16, %v3722_v23  ;;  %v3654_v24 = vadd.f32 %v4947_v17, %v3653_v2  ;;  %v3724_v27 = vpop.f32.mrb[37].mxu1 }
 0xc0c   : > { %4940 = vst [vmem:[%s5439_s24 + $0xb8] sm:$0xff] %v3545_v22  ;;  %v3725_v29 = vadd.f32 %v4949_v21, %v3724_v27  ;;  %v3727_v63 = vmax.f32 %v3652_v4, 0.0 }
 0xc0d   : > { %v3728_v28 = vmax.f32 %v3654_v24, 0.0  ;;  %v3729_v38 = vmax.f32 %v3723_v36, 0.0 }
 0xc0e   : > { %v3730_v37 = vmax.f32 %v3725_v29, 0.0 }
 0xc0f   : > { %3731 = vmatprep.subr.mxu0 %v3728_v28  ;;  %v5836_v28 = vld [vmem:[%s5302_s25 + $0xe8] sm:$0xff] }
 0xc10   : > { %3802 = vmatprep.subr.mxu1 %v3730_v37  ;;  %3732 = vmatpush1.msra.mxu0 %v3727_v63  ;;  %v5839_v63 = vld [vmem:[%s5302_s25 + $0xf8] sm:$0xff] }
 0xc11   : > { %3803 = vmatpush1.msra.mxu1 %v3729_v38  ;;  %4952 = vmatmul.mubr.msk.f32.vlgmr.msra.gmra.mrb[38].mxu0 %vm337_vm0, %v5736_v8 }
 0xc12   : > { %4953 = vmatmul.mubr.msk.f32.vlgmr.msra.gmra.mrb[38].mxu1 %vm337_vm0, %v5736_v8  ;;  %4001 = vmatprep.mubr.f32.mxu0 %v5240_v0 }
 0xc13   : > { %4072 = vmatprep.mubr.f32.mxu1 %v5240_v0 }
 0xce4   : > { %v3797_v39 = vpop.f32.mrb[38].mxu0 }
 0xce5   : > { %v3798_v40 = vadd.f32 %v3797_v39, %v5358_v26  ;;  %v3868_v41 = vpop.f32.mrb[38].mxu1  ;;  %v3799_v42 = vpop.f32.mrb[39].mxu0 }
 0xce6   : > { %v3869_v43 = vadd.f32 %v3868_v41, %v5358_v26  ;;  %v3800_v44 = vadd.f32 %v3799_v42, %v5358_v26  ;;  %v3870_v45 = vpop.f32.mrb[39].mxu1 }
 0xce7   : > { %v4954_v46 = vmul.f32 -1.442695, %v3798_v40  ;;  %v3871_v47 = vadd.f32 %v3870_v45, %v5358_v26 }
 0xce8   : > { %v4956_v48 = vmul.f32 -1.442695, %v3869_v43  ;;  %v4955_v49 = vmul.f32 -1.442695, %v3800_v44  ;;  %v4969_v44 = vld [vmem:[%s5341_s9 + $0xe0] sm:$0xff] }
 0xce9   : > { %5182 = vpow2.f32 %v4954_v46  ;;  %v4957_v25 = vmul.f32 -1.442695, %v3871_v47  ;;  %v4971_v46 = vld [vmem:[%s5341_s9 + $0xf0] sm:$0xff]  ;;  %v4970_v47 = vld [vmem:[%s5341_s9 + $0xe8] sm:$0xff] }
 0xcea   : > { %5184 = vpow2.f32 %v4956_v48 }
 0xceb   : > { %5186 = vpow2.f32 %v4955_v49 }
 0xcec   : > { %5188 = vpow2.f32 %v4957_v25 }
 0xcf3   : > { %v5183_v50 = vpop.eup %5182 }
 0xcf4   : > { %v5185_v53 = vpop.eup %5184  ;;  %v3885_v54 = vadd.f32 1.0, %v5183_v50  ;;  %v4972_v50 = vld [vmem:[%s5341_s9 + $0xf8] sm:$0xff] }
 0xcf5   : > { %v5187_v55 = vpop.eup %5186  ;;  %v3887_v57 = vadd.f32 1.0, %v5185_v53 }
 0xcf6   : > { %v5189_v58 = vpop.eup %5188  ;;  %5190 = vrcp.f32 %v3885_v54  ;;  %v3886_v7 = vadd.f32 1.0, %v5187_v55 }
 0xcf7   : > { %5192 = vrcp.f32 %v3887_v57  ;;  %v3888_v59 = vadd.f32 1.0, %v5189_v58 }
 0xcf8   : > { %5194 = vrcp.f32 %v3886_v7 }
 0xcf9   : > { %5196 = vrcp.f32 %v3888_v59 }
 0xd00   : > { %v5191_v5 = vpop.eup %5190 }
 0xd01   : > { %v5193_v6 = vpop.eup %5192  ;;  %v3900_v3 = vrot.slane %v5191_v5, %v5364_v51  ;;  %v3920_v62 = vrot.slane %v5191_v5, %v5366_v52 }
 0xd02   : > { %v5195_v34 = vpop.eup %5194  ;;  %v3908_v9 = vrot.slane %v5193_v6, %v5364_v51  ;;  %v3928_v10 = vrot.slane %v5193_v6, %v5366_v52 }
 0xd03   : > { %v5197_v11 = vpop.eup %5196  ;;  %v4092_v12 = vcombine.low %v5191_v5, %v5195_v34  ;;  %v3904_v13 = vrot.slane %v5195_v34, %v5364_v51  ;;  %v3924_v14 = vrot.slane %v5195_v34, %v5366_v52  ;;  %v3913_v15 = vmul.f32 %v5775_v32, %v3900_v3 }
 0xd04   : > { %v4093_v1 = vcombine.low %v5193_v6, %v5197_v11  ;;  %v3912_v16 = vrot.slane %v5197_v11, %v5364_v51  ;;  %v3932_v17 = vrot.slane %v5197_v11, %v5366_v52  ;;  %v3933_v18 = vmul.f32 %v5775_v32, %v3920_v62 }
 0xd05   : > { %v4100_v19 = vrot.slane %v4092_v12, %v5368_v56  ;;  %v3914_v20 = vmul.f32 %v5767_v60, %v3904_v13  ;;  %v3934_v21 = vmul.f32 %v5767_v60, %v3924_v14  ;;  %v3915_v22 = vmul.f32 %v5779_v31, %v3908_v9 }
 0xd06   : > { %v4107_v4 = vrot.slane %v4093_v1, %v5368_v56  ;;  %v3916_v23 = vmul.f32 %v5770_v61, %v3912_v16  ;;  %v3936_v2 = vmul.f32 %v5770_v61, %v3932_v17  ;;  %v3935_v32 = vmul.f32 %v5779_v31, %v3928_v10  ;;  %v5844_v61 = vld [vmem:[%s5302_s25 + $0xe0] sm:$0xff]  ;;  %v5848_v31 = vld [vmem:[%s5302_s25 + $0xf0] sm:$0xff] }
 0xd07   : > { %v5042_v36 = vpack.c.bf16 %v3934_v21, %v3914_v20  ;;  %v5044_v29 = vpack.c.bf16 %v3933_v18, %v3913_v15 }
 0xd08   : > { %v4108_v24 = vcombine.low %v4100_v19, %v4107_v4  ;;  %v5046_v27 = vpack.c.bf16 %v3936_v2, %v3916_v23  ;;  %v5048_v60 = vpack.c.bf16 %v3935_v32, %v3915_v22 }
 0xd09   : > { %5043 = vmatprep.subr.bf16.mxu0 %v5042_v36 }
 0xd0a   : > { %4964 = vst [vmem:[%s5395_s17 + $0x30] sm:$0xff] %v4108_v24  ;;  %5047 = vmatprep.subr.bf16.mxu1 %v5046_v27  ;;  %5045 = vmatpush1.bf16.msra.mxu0 %v5044_v29 }
 0xd0b   : > { %5049 = vmatpush1.bf16.msra.mxu1 %v5048_v60  ;;  %4122 = vmatprep.subr.mxu0 %v5836_v28 }
 0xd0c   : > { %4193 = vmatprep.subr.mxu1 %v5839_v63 }
 0xd0d   : > { %4958 = vmatmul.mubr.msk.f32.vlgmr.msra.gmra.mrb[40].mxu0 %vm714_vm2, %v5406_v30 }
 0xd0e   : > { %4959 = vmatmul.mubr.msk.f32.vlgmr.msra.gmra.mrb[40].mxu1 %vm714_vm2, %v5406_v30  ;;  %4123 = vmatpush1.msra.mxu0 %v5844_v61 }
 0xd0f   : > { %4186 = vmatprep.mubr.f32.mxu0 %v5240_v0  ;;  %4194 = vmatpush1.msra.mxu1 %v5848_v31 }
 0xd10   : > { %4257 = vmatprep.mubr.f32.mxu1 %v5240_v0 }
 0xd11   : > { %4973 = vmatmul.mubr.msk.f32.vlgmr.msra.gmra.mrb[42].mxu0 %vm337_vm0, %v5713_v33 }
 0xd12   : > { %4974 = vmatmul.mubr.msk.f32.vlgmr.msra.gmra.mrb[42].mxu1 %vm337_vm0, %v5713_v33  ;;  %4332 = vmatprep.mubr.f32.mxu0 %v5240_v0 }
 0xd13   : > { %4403 = vmatprep.mubr.f32.mxu1 %v5240_v0 }
 0xde0   : > { %v4003_v37 = vpop.f32.mrb[40].mxu0 }
 0xde1   : > { %v4004_v38 = vadd.f32 %v4003_v37, %v5432_v35  ;;  %v4074_v39 = vpop.f32.mrb[40].mxu1  ;;  %v4005_v40 = vpop.f32.mrb[41].mxu0 }
 0xde2   : > { %v4075_v41 = vadd.f32 %v4074_v39, %v5432_v35  ;;  %v4006_v42 = vadd.f32 %v4005_v40, %v5432_v35  ;;  %v4076_v43 = vpop.f32.mrb[41].mxu1 }
 0xde3   : > { %v4079_v33 = vmax.f32 %v4004_v38, 0.0  ;;  %v4077_v45 = vadd.f32 %v4076_v43, %v5432_v35 }
 0xde4   : > { %v4081_v48 = vmax.f32 %v4075_v41, 0.0  ;;  %v4080_v49 = vmax.f32 %v4006_v42, 0.0  ;;  %v4188_v25 = vpop.f32.mrb[42].mxu0 }
 0xde5   : > { %4960 = vst [vmem:[%s5439_s24 + $0xc0] sm:$0xff] %v4079_v33  ;;  %v4082_v53 = vmax.f32 %v4077_v45, 0.0  ;;  %v4189_v54 = vadd.f32 %v4969_v44, %v4188_v25  ;;  %v4259_v55 = vpop.f32.mrb[42].mxu1  ;;  %v4190_v57 = vpop.f32.mrb[43].mxu0 }
 0xde6   : > { %4962 = vst [vmem:[%s5439_s24 + $0xd0] sm:$0xff] %v4081_v48  ;;  %4961 = vst [vmem:[%s5439_s24 + $0xc8] sm:$0xff] %v4080_v49  ;;  %v4260_v58 = vadd.f32 %v4971_v46, %v4259_v55  ;;  %v4191_v7 = vadd.f32 %v4970_v47, %v4190_v57  ;;  %v4261_v59 = vpop.f32.mrb[43].mxu1 }
 0xde7   : > { %4963 = vst [vmem:[%s5439_s24 + $0xd8] sm:$0xff] %v4082_v53  ;;  %v4262_v5 = vadd.f32 %v4972_v50, %v4261_v59  ;;  %v4264_v3 = vmax.f32 %v4189_v54, 0.0 }
 0xde8   : > { %v4265_v6 = vmax.f32 %v4191_v7, 0.0  ;;  %v4266_v34 = vmax.f32 %v4260_v58, 0.0 }
 0xde9   : > { %v4267_v62 = vmax.f32 %v4262_v5, 0.0 }
 0xdea   : > { %4268 = vmatprep.subr.mxu0 %v4265_v6 }
 0xdeb   : > { %4339 = vmatprep.subr.mxu1 %v4267_v62  ;;  %4269 = vmatpush1.msra.mxu0 %v4264_v3 }
 0xdec   : > { %4340 = vmatpush1.msra.mxu1 %v4266_v34  ;;  %4975 = vmatmul.mubr.msk.f32.vlgmr.msra.gmra.mrb[44].mxu0 %vm337_vm0, %v5736_v8 }
 0xded   : > { %4976 = vmatmul.mubr.msk.f32.vlgmr.msra.gmra.mrb[44].mxu1 %vm337_vm0, %v5736_v8  ;;  %4538 = vmatprep.mubr.f32.mxu0 %v5240_v0 }
 0xdee   : > { %4609 = vmatprep.mubr.f32.mxu1 %v5240_v0 }
 0xebf   : > { %v4334_v9 = vpop.f32.mrb[44].mxu0 }
 0xec0   : > { %v4335_v10 = vadd.f32 %v4334_v9, %v5358_v26  ;;  %v4405_v11 = vpop.f32.mrb[44].mxu1  ;;  %v4336_v12 = vpop.f32.mrb[45].mxu0 }
 0xec1   : > { %v4406_v13 = vadd.f32 %v4405_v11, %v5358_v26  ;;  %v4337_v14 = vadd.f32 %v4336_v12, %v5358_v26  ;;  %v4407_v15 = vpop.f32.mrb[45].mxu1 }
 0xec2   : > { %v4977_v1 = vmul.f32 -1.442695, %v4335_v10  ;;  %v4408_v16 = vadd.f32 %v4407_v15, %v5358_v26 }
 0xec3   : > { %v4979_v17 = vmul.f32 -1.442695, %v4406_v13  ;;  %v4978_v18 = vmul.f32 -1.442695, %v4337_v14 }
 0xec4   : > { %5198 = vpow2.f32 %v4977_v1  ;;  %v4980_v8 = vmul.f32 -1.442695, %v4408_v16 }
 0xec5   : > { %5200 = vpow2.f32 %v4979_v17 }
 0xec6   : > { %5202 = vpow2.f32 %v4978_v18 }
 0xec7   : > { %5204 = vpow2.f32 %v4980_v8 }
 0xece   : > { %v5199_v0 = vpop.eup %5198 }
 0xecf   : > { %v5201_v19 = vpop.eup %5200  ;;  %v4422_v20 = vadd.f32 1.0, %v5199_v0 }
 0xed0   : > { %v5203_v21 = vpop.eup %5202  ;;  %v4424_v22 = vadd.f32 1.0, %v5201_v19 }
 0xed1   : > { %v5205_v4 = vpop.eup %5204  ;;  %5206 = vrcp.f32 %v4422_v20  ;;  %v4423_v23 = vadd.f32 1.0, %v5203_v21 }
 0xed2   : > { %5208 = vrcp.f32 %v4424_v22  ;;  %v4425_v2 = vadd.f32 1.0, %v5205_v4 }
 0xed3   : > { %5210 = vrcp.f32 %v4423_v23 }
 0xed4   : > { %5212 = vrcp.f32 %v4425_v2 }
 0xedb   : > { %v5207_v26 = vpop.eup %5206 }
 0xedc   : > { %v5209_v36 = vpop.eup %5208  ;;  %v4437_v32 = vrot.slane %v5207_v26, %v5364_v51  ;;  %v4457_v24 = vrot.slane %v5207_v26, %v5366_v52 }
 0xedd   : > { %v5211_v27 = vpop.eup %5210  ;;  %v4445_v29 = vrot.slane %v5209_v36, %v5364_v51  ;;  %v4465_v60 = vrot.slane %v5209_v36, %v5366_v52 }
 0xede   : > { %v5213_v37 = vpop.eup %5212  ;;  %v4629_v38 = vcombine.low %v5207_v26, %v5211_v27  ;;  %v4441_v39 = vrot.slane %v5211_v27, %v5364_v51  ;;  %v4461_v40 = vrot.slane %v5211_v27, %v5366_v52  ;;  %v4450_v41 = vmul.f32 %v5844_v61, %v4437_v32 }
 0xedf   : > { %v4630_v42 = vcombine.low %v5209_v36, %v5213_v37  ;;  %v4449_v43 = vrot.slane %v5213_v37, %v5364_v51  ;;  %v4469_v44 = vrot.slane %v5213_v37, %v5366_v52  ;;  %v4470_v33 = vmul.f32 %v5844_v61, %v4457_v24 }
 0xee0   : > { %v4637_v45 = vrot.slane %v4629_v38, %v5368_v56  ;;  %v4451_v46 = vmul.f32 %v5836_v28, %v4441_v39  ;;  %v4471_v47 = vmul.f32 %v5836_v28, %v4461_v40  ;;  %v4452_v48 = vmul.f32 %v5848_v31, %v4445_v29 }
 0xee1   : > { %v4644_v49 = vrot.slane %v4630_v42, %v5368_v56  ;;  %v4453_v25 = vmul.f32 %v5839_v63, %v4449_v43  ;;  %v4473_v50 = vmul.f32 %v5839_v63, %v4469_v44  ;;  %v4472_v52 = vmul.f32 %v5848_v31, %v4465_v60 }
 0xee2   : > { %v5050_v51 = vpack.c.bf16 %v4471_v47, %v4451_v46  ;;  %v5052_v61 = vpack.c.bf16 %v4470_v33, %v4450_v41 }
 0xee3   : > { %v4645_v53 = vcombine.low %v4637_v45, %v4644_v49  ;;  %v5054_v54 = vpack.c.bf16 %v4473_v50, %v4453_v25  ;;  %v5056_v55 = vpack.c.bf16 %v4472_v52, %v4452_v48 }
 0xee4   : > { %5051 = vmatprep.subr.bf16.mxu0 %v5050_v51 }
 0xee5   : > { %4987 = vst [vmem:[%s5395_s17 + $0x38] sm:$0xff] %v4645_v53  ;;  %5055 = vmatprep.subr.bf16.mxu1 %v5054_v54  ;;  %5053 = vmatpush1.bf16.msra.mxu0 %v5052_v61 }
 0xee6   : > { %5057 = vmatpush1.bf16.msra.mxu1 %v5056_v55 }
 0xee8   : > { %4981 = vmatmul.mubr.msk.f32.vlgmr.msra.gmra.mrb[46].mxu0 %vm714_vm2, %v5406_v30 }
 0xee9   : > { %4982 = vmatmul.mubr.msk.f32.vlgmr.msra.gmra.mrb[46].mxu1 %vm714_vm2, %v5406_v30 }
 0xfbb   : > { %v4540_v56 = vpop.f32.mrb[46].mxu0 }
 0xfbc   : > { %v4541_v28 = vadd.f32 %v4540_v56, %v5432_v35  ;;  %v4611_v63 = vpop.f32.mrb[46].mxu1  ;;  %v4542_v31 = vpop.f32.mrb[47].mxu0 }
 0xfbd   : > { %v4612_v57 = vadd.f32 %v4611_v63, %v5432_v35  ;;  %v4543_v58 = vadd.f32 %v4542_v31, %v5432_v35  ;;  %v4613_v7 = vpop.f32.mrb[47].mxu1 }
 0xfbe   : > { %v4616_v59 = vmax.f32 %v4541_v28, 0.0  ;;  %v4614_v5 = vadd.f32 %v4613_v7, %v5432_v35 }
 0xfbf   : > { %v4618_v6 = vmax.f32 %v4612_v57, 0.0  ;;  %v4617_v3 = vmax.f32 %v4543_v58, 0.0 }
 0xfc0   : > { %4983 = vst [vmem:[%s5439_s24 + $0xe0] sm:$0xff] %v4616_v59  ;;  %v4619_v62 = vmax.f32 %v4614_v5, 0.0 }
 0xfc1   : > { %4985 = vst [vmem:[%s5439_s24 + $0xf0] sm:$0xff] %v4618_v6  ;;  %4984 = vst [vmem:[%s5439_s24 + $0xe8] sm:$0xff] %v4617_v3 }
 0xfc2   : > { %4986 = vst [vmem:[%s5439_s24 + $0xf8] sm:$0xff] %v4619_v62 }
 0xfc3 PF: > { %s16_s20 = sadd.s32 1, %s5238_s20   ;;  %s5932_s18 = smov %s5234_s19 }
 0xfc4   : > { %p13_p5 = scmp.ge.s32.totalorder %s16_s20, 4   ;;  %s5933_s19 = smov %s5935_s21 }
 0xfc6   :  { %15 = sbr.rel (!%p13_p5) target bundleno = 2 (0x2), region = 109 }

</bundles_post_ra>
